<compile_context>
chip_gen: v6e
topology: v6e:2x2x1
jax: 0.10.0
libtpu: 0.0.40
codegen_flags: <defaults>
</compile_context>

<pallas_src>
import functools

import jax
import jax.numpy as jnp
from jax.experimental import pallas as pl
from jax.experimental.pallas import tpu as pltpu

LAMBDA_A = 0.5  # opt['lambda_a']


# ---------------------------------------------------------------------------
# Kernels (one batch tile per grid step; weights stay VMEM-resident)
# ---------------------------------------------------------------------------
def _user_attention_kernel(id_ref, seq_ref, mask_ref, watt_ref, batt_ref,
                           wagg_ref, out_ref, *, lambda_a):
    seq = seq_ref[...]                                   # (TB, S, D) compute dtype
    id_emb = id_ref[...]                                 # (TB, D)    f32
    wagg = wagg_ref[...]                                 # (D, D)
    tb, s, d = seq.shape

    # key = tanh(Linear(seq)): ONE (TB*S, D) @ (D, D) MXU matmul instead of TB
    # small batched matmuls.  The reshape is a free relayout when S is a
    # multiple of 8 (16 for bf16).
    proj = jnp.dot(seq.reshape(tb * s, d), watt_ref[...],
                   preferred_element_type=jnp.float32)
    key = jnp.tanh(proj + batt_ref[...]).reshape(tb, s, d)         # f32

    # attention logits: degenerate N=1 contraction -> VPU multiply + lane reduce
    attn = jnp.sum(key * id_emb[:, None, :], axis=-1)              # (TB, S) f32

    # masked_softmax quirk of the reference module: masked logits are set to 0
    # (NOT -inf), and there is no row-max subtraction (matches torch.exp path).
    attn = jnp.where(mask_ref[...] != 0.0, 0.0, attn)
    e_x = jnp.exp(attn)
    denom = jnp.sum(e_x, axis=1, keepdims=True) + 1e-12
    attn = e_x * pl.reciprocal(denom, approx=True)                 # EUP divide

    # weighted pooling (M=1 contraction -> VPU), then W_agg on the MXU
    pooled = jnp.sum(attn[..., None] * seq.astype(jnp.float32), axis=1)   # (TB, D)
    out_agg = jnp.dot(pooled.astype(wagg.dtype), wagg,
                      preferred_element_type=jnp.float32)

    out_ref[...] = lambda_a * id_emb + (1.0 - lambda_a) * out_agg


def _mean_kernel(id_ref, seq_ref, valid_ref, wagg_ref, out_ref, *, lambda_a):
    seq = seq_ref[...]                                   # (TB, S, D) compute dtype
    id_emb = id_ref[...]                                 # (TB, D)    f32
    wagg = wagg_ref[...]                                 # (D, D)

    denom = jnp.sum(valid_ref[...], axis=-1, keepdims=True) + 1e-12        # (TB, 1)
    mean = jnp.sum(seq.astype(jnp.float32), axis=1) * pl.reciprocal(denom, approx=True)
    out_agg = jnp.dot(mean.astype(wagg.dtype), wagg,
                      preferred_element_type=jnp.float32)

    out_ref[...] = lambda_a * id_emb + (1.0 - lambda_a) * out_agg


def _item_similarity_kernel(id_ref, seq_ref, score_ref, wagg_ref, out_ref, *, lambda_a):
    seq = seq_ref[...]                                   # (TB, S, D) compute dtype
    id_emb = id_ref[...]                                 # (TB, D)    f32
    wagg = wagg_ref[...]                                 # (D, D)

    score = score_ref[...]                                                  # (TB, S) f32
    score = score - jnp.max(score, axis=-1, keepdims=True)                  # F.softmax is max-stabilized
    e_s = jnp.exp(score)
    w = e_s * pl.reciprocal(jnp.sum(e_s, axis=-1, keepdims=True), approx=True)
    ans = jnp.sum(w[..., None] * seq.astype(jnp.float32), axis=1)           # (TB, D)
    out_agg = jnp.dot(ans.astype(wagg.dtype), wagg,
                      preferred_element_type=jnp.float32)

    out_ref[...] = lambda_a * id_emb + (1.0 - lambda_a) * out_agg


# ---------------------------------------------------------------------------
# VMEM budgeting / tile selection
# ---------------------------------------------------------------------------
# Approximate number of live (tb, S, D)-sized f32 intermediates inside each
# kernel (key, key*id product, attn*seq product, upcast copy, ...); used to
# size the batch tile against the real live set.
_N_F32_TEMPS = {'user_attention': 4, 'mean': 2, 'item_similarity': 2}


def _vmem_budget_bytes():
    """~70% of per-core physical VMEM, capped at 96 MiB.

    v5e / v6e: 128 MiB physical -> ~90 MiB scoped limit.
    v7x      :  64 MiB per TC   -> ~45 MiB scoped limit (batch tiles are
               sharded across the 2 TensorCores, so the budget is per-TC).
    Falls back to the conservative v7x number if the query is unavailable.
    """
    phys = None
    try:
        info = pltpu.get_tpu_info()
        for name in ('vmem_capacity_bytes', 'vmem_bytes', 'vmem_size_bytes'):
            val = getattr(info, name, None)
            if val:
                phys = int(val)
                break
    except Exception:
        phys = None
    if not phys:
        phys = 64 * 1024 * 1024
    return min(int(phys * 0.70), 96 * 1024 * 1024)


def _choose_batch_tile(B, S, D, seq_itemsize, budget_bytes, n_f32_temps):
    """Largest 8-aligned batch tile whose live set fits ~80% of the scoped VMEM
    budget, capped at ~ceil(B/4) so the grid never degenerates to a single step
    (both v7x TensorCores get >=2 pipelined steps; DMA overlaps compute)."""
    if B <= 8:
        return B
    fixed = 2 * 2 * D * D * seq_itemsize + 2 * D * 4 + (1 << 16)   # dbuffered weights + bias + slack
    per_row = S * D * (2 * seq_itemsize + n_f32_temps * 4)         # 2x-buffered seq + f32 temps
    per_row += 4 * (6 * D + 4 * S)                                 # id/out/mask/score blocks
    rows = int((budget_bytes * 0.8 - fixed) // per_row)
    rows = max(8, (rows // 8) * 8)
    max_rows = max(8, ((pl.cdiv(B, 4) + 7) // 8) * 8)
    return min(rows, max_rows)
    # TODO(synk): if a single 8-row slab of (S, D) ever exceeds the budget,
    # tile the sequence axis as well instead of blowing the VMEM limit.


# ---------------------------------------------------------------------------
# Wrapper
# ---------------------------------------------------------------------------
def behavior_aggregator(id_emb, sequence_emb, score, params,
                        aggregator='user_attention', lambda_a=LAMBDA_A,
                        compute_dtype=jnp.bfloat16, batch_tile=None):
    """Forward pass of UniCDR's BehaviorAggregator.

    compute_dtype is the dtype of the streamed sequence block and the MXU
    weight operands (bf16 halves the dominant HBM read and hits the fast MXU
    path on v5e); accumulation, softmax and the output blend are always f32.
    """
    if aggregator not in ('user_attention', 'mean', 'item_similarity'):
        raise ValueError('a wrong aggregater!!')

    B, S, D = sequence_emb.shape
    cdtype = jnp.dtype(compute_dtype)
    itemsize = cdtype.itemsize

    budget = _vmem_budget_bytes()
    n_temps = _N_F32_TEMPS[aggregator]
    if batch_tile is not None:
        tb = min(int(batch_tile), B)
        if tb < B:
            tb = max(8, (tb // 8) * 8)          # keep (8,128)-friendly blocks
    else:
        tb = _choose_batch_tile(B, S, D, itemsize, budget, n_temps)
    # Ragged last block is handled by Pallas OOB-block semantics (rows are
    # independent; OOB writes are dropped) -> no wrapper-side jnp.pad copy of
    # the dominant (B, S, D) array.
    n_blocks = pl.cdiv(B, tb)

    # Cast the streamed operands. The zero-row padding mask is computed on the
    # ORIGINAL f32 data so the bf16 cast can never flip a position in/out of
    # the mask (in production this mask comes straight from the padding ids).
    seq_c = sequence_emb.astype(cdtype)
    wagg_c = params['W_agg_T'].astype(cdtype)

    id_spec = pl.BlockSpec((tb, D), lambda i: (i, 0))
    seq_spec = pl.BlockSpec((tb, S, D), lambda i: (i, 0, 0))
    row_spec = pl.BlockSpec((tb, S), lambda i: (i, 0))
    w_spec = pl.BlockSpec((D, D), lambda i: (0, 0))      # weights stay VMEM-resident
    b_spec = pl.BlockSpec((1, D), lambda i: (0, 0))
    out_spec = pl.BlockSpec((tb, D), lambda i: (i, 0))
    out_shape = jax.ShapeDtypeStruct((B, D), jnp.float32)

    compiler_params = pltpu.CompilerParams(
        dimension_semantics=("parallel",),      # megacore-shard batch tiles (v7x)
        vmem_limit_bytes=int(budget),           # raised explicitly; tiles sized to fit
    )

    seq_bytes = B * S * D * itemsize
    if aggregator == 'user_attention':
        mask = (jnp.sum(sequence_emb, axis=-1) == 0.0).astype(jnp.float32)
        watt_c = params['W_att_T'].astype(cdtype)
        cost = pl.CostEstimate(
            flops=2 * B * S * D * D + 2 * B * D * D + 6 * B * S * D,
            transcendentals=B * S * D + B * S,
            bytes_accessed=seq_bytes + 4 * (B * S + 3 * B * D + D) + 2 * itemsize * D * D)
        return pl.pallas_call(
            functools.partial(_user_attention_kernel, lambda_a=lambda_a),
            out_shape=out_shape,
            grid=(n_blocks,),
            in_specs=[id_spec, seq_spec, row_spec, w_spec, b_spec, w_spec],
            out_specs=out_spec,
            compiler_params=compiler_params,
            cost_estimate=cost,
        )(id_emb, seq_c, mask, watt_c, params['b_att'], wagg_c)

    if aggregator == 'mean':
        valid = (jnp.sum(sequence_emb, axis=-1) != 0.0).astype(jnp.float32)
        cost = pl.CostEstimate(
            flops=2 * B * D * D + 3 * B * S * D,
            transcendentals=0,
            bytes_accessed=seq_bytes + 4 * (B * S + 3 * B * D) + itemsize * D * D)
        return pl.pallas_call(
            functools.partial(_mean_kernel, lambda_a=lambda_a),
            out_shape=out_shape,
            grid=(n_blocks,),
            in_specs=[id_spec, seq_spec, row_spec, w_spec],
            out_specs=out_spec,
            compiler_params=compiler_params,
            cost_estimate=cost,
        )(id_emb, seq_c, valid, wagg_c)

    # item_similarity
    cost = pl.CostEstimate(
        flops=2 * B * D * D + 3 * B * S * D,
        transcendentals=B * S,
        bytes_accessed=seq_bytes + 4 * (B * S + 3 * B * D) + itemsize * D * D)
    return pl.pallas_call(
        functools.partial(_item_similarity_kernel, lambda_a=lambda_a),
        out_shape=out_shape,
        grid=(n_blocks,),
        in_specs=[id_spec, seq_spec, row_spec, w_spec],
        out_specs=out_spec,
        compiler_params=compiler_params,
        cost_estimate=cost,
    )(id_emb, seq_c, score, wagg_c)


# ---------------------------------------------------------------------------
# Pure-JAX reference (mirrors the PyTorch module) for correctness checks.
# ---------------------------------------------------------------------------
def _reference(id_emb, seq, score, params, aggregator, lambda_a):
    hp = jax.lax.Precision.HIGHEST
    if aggregator == 'user_attention':
        key = jnp.tanh(jnp.einsum('bsd,de->bse', seq, params['W_att_T'], precision=hp)
                       + params['b_att'])
        mask = jnp.sum(seq, axis=-1) == 0.0
        attn = jnp.einsum('bsd,bd->bs', key, id_emb, precision=hp)
        attn = jnp.where(mask, 0.0, attn)
        e_x = jnp.exp(attn)
        attn = e_x / (jnp.sum(e_x, axis=1, keepdims=True) + 1e-12)
        out = jnp.einsum('bs,bsd->bd', attn, seq, precision=hp)
        out = jnp.einsum('bd,de->be', out, params['W_agg_T'], precision=hp)
    elif aggregator == 'mean':
        valid = (jnp.sum(seq, axis=-1) != 0.0).astype(jnp.float32)
        mean = jnp.sum(seq, axis=1) / (jnp.sum(valid, axis=-1, keepdims=True) + 1e-12)
        out = jnp.einsum('bd,de->be', mean, params['W_agg_T'], precision=hp)
    else:
        sc = jax.nn.softmax(score, axis=-1)
        out = jnp.einsum('bs,bsd->bd', sc, seq, precision=hp)
        out = jnp.einsum('bd,de->be', out, params['W_agg_T'], precision=hp)
    return lambda_a * id_emb + (1.0 - lambda_a) * out


def _make_inputs(key, B, S, D):
    k_id, k_seq, k_score, k_watt, k_batt, k_wagg, k_mask = jax.random.split(key, 7)
    id_emb = 0.5 * jax.random.normal(k_id, (B, D), dtype=jnp.float32)
    sequence_emb = jax.random.normal(k_seq, (B, S, D), dtype=jnp.float32)
    # zero out some sequence positions to exercise the padding mask
    pad = (jax.random.uniform(k_mask, (B, S)) < 0.3).astype(jnp.float32)
    sequence_emb = sequence_emb * (1.0 - pad)[..., None]
    score = jax.random.normal(k_score, (B, S), dtype=jnp.float32)
    params = {
        'W_att_T': 0.1 * jax.random.normal(k_watt, (D, D), jnp.float32),  # W_att.weight.T
        'b_att':   0.1 * jax.random.normal(k_batt, (1, D), jnp.float32),  # W_att.bias
        'W_agg_T': 0.1 * jax.random.normal(k_wagg, (D, D), jnp.float32),  # W_agg.weight.T
    }
    return id_emb, sequence_emb, score, params


if __name__ == "__main__":
    key = jax.random.PRNGKey(0)
    ok = True

    # (B, S, D, forced batch_tile, compute dtypes to exercise)
    configs = [
        (64, 16, 128, None, (jnp.float32, jnp.bfloat16)),  # auto tile, lane-dense D, multi-step grid
        (52, 16, 128, 16,   (jnp.float32,)),               # ragged last block (no wrapper-side pad copy)
        (4,  16, 64,  None, (jnp.bfloat16,)),              # tiny batch -> single whole-batch block
    ]
    for (B, S, D, tile, dtypes) in configs:
        key, sub = jax.random.split(key)
        id_emb, sequence_emb, score, params = _make_inputs(sub, B, S, D)
        for agg in ('user_attention', 'mean', 'item_similarity'):
            for cdtype in dtypes:
                out = behavior_aggregator(id_emb, sequence_emb, score, params,
                                          aggregator=agg, lambda_a=LAMBDA_A,
                                          compute_dtype=cdtype, batch_tile=tile)
                out = jax.block_until_ready(out)
                if jnp.dtype(cdtype) == jnp.float32:
                    ref = _reference(id_emb, sequence_emb, score, params, agg, LAMBDA_A)
                    tol = 2e-2   # covers approx reciprocal + MXU f32 pass behavior
                else:
                    # compare against a reference evaluated on the same
                    # bf16-quantized streamed operands (input quantization is
                    # shared; remaining diff is f32-accum / pooled cast only)
                    seq_q = sequence_emb.astype(cdtype).astype(jnp.float32)
                    params_q = dict(
                        params,
                        W_att_T=params['W_att_T'].astype(cdtype).astype(jnp.float32),
                        W_agg_T=params['W_agg_T'].astype(cdtype).astype(jnp.float32))
                    ref = _reference(id_emb, seq_q, score, params_q, agg, LAMBDA_A)
                    tol = 4e-2
                if not jnp.allclose(out, ref, atol=tol, rtol=tol):
                    ok = False
                    err = float(jnp.max(jnp.abs(out - ref)))
                    print(f"MISMATCH agg={agg} B={B} D={D} "
                          f"dtype={jnp.dtype(cdtype).name} max_abs_err={err:.4g}")

    if ok:
        print("KERNEL_OK")
</pallas_src>

<mosaic_0001>
module attributes {stable_mosaic.version = 11 : i64} {
  func.func @_user_attention_kernel(%arg0: i32, %arg1: memref<16x128xf32, #tpu.memory_space<vmem>>, %arg2: memref<16x16x128xf32, #tpu.memory_space<vmem>>, %arg3: memref<16x16xf32, #tpu.memory_space<vmem>>, %arg4: memref<128x128xf32, #tpu.memory_space<vmem>>, %arg5: memref<1x128xf32, #tpu.memory_space<vmem>>, %arg6: memref<128x128xf32, #tpu.memory_space<vmem>>, %arg7: memref<16x128xf32, #tpu.memory_space<vmem>>) attributes {dimension_semantics = [#tpu.dimension_semantics<parallel>], iteration_bounds = array<i64: 4>, scalar_prefetch = 0 : i64, scratch_operands = 0 : i64, tpu.core_type = #tpu.core_type<tc>, window_params = [{transform_indices = @transform_0, window_bounds = array<i64: 16, 128>}, {transform_indices = @transform_1, window_bounds = array<i64: 16, 16, 128>}, {transform_indices = @transform_2, window_bounds = array<i64: 16, 16>}, {pipeline_mode = #tpu.pipeline_mode<synchronous>, transform_indices = @transform_3, window_bounds = array<i64: 128, 128>}, {pipeline_mode = #tpu.pipeline_mode<synchronous>, transform_indices = @transform_4, window_bounds = array<i64: 1, 128>}, {pipeline_mode = #tpu.pipeline_mode<synchronous>, transform_indices = @transform_5, window_bounds = array<i64: 128, 128>}, {transform_indices = @transform_6, window_bounds = array<i64: 16, 128>}]} {
    %c0 = arith.constant 0 : index
    %c0_0 = arith.constant 0 : index
    %c0_1 = arith.constant 0 : index
    %0 = vector.load %arg2[%c0, %c0_0, %c0_1] : memref<16x16x128xf32, #tpu.memory_space<vmem>>, vector<16x16x128xf32>
    %c0_2 = arith.constant 0 : index
    %c0_3 = arith.constant 0 : index
    %1 = vector.load %arg1[%c0_2, %c0_3] : memref<16x128xf32, #tpu.memory_space<vmem>>, vector<16x128xf32>
    %c0_4 = arith.constant 0 : index
    %c0_5 = arith.constant 0 : index
    %2 = vector.load %arg6[%c0_4, %c0_5] : memref<128x128xf32, #tpu.memory_space<vmem>>, vector<128x128xf32>
    %3 = vector.shape_cast %0 : vector<16x16x128xf32> to vector<256x128xf32>
    %c0_6 = arith.constant 0 : index
    %c0_7 = arith.constant 0 : index
    %4 = vector.load %arg4[%c0_6, %c0_7] : memref<128x128xf32, #tpu.memory_space<vmem>>, vector<128x128xf32>
    %cst = arith.constant dense<0.000000e+00> : vector<256x128xf32>
    %5 = tpu.matmul %3, %4, %cst {dimension_numbers = #tpu.dot_dimension_numbers<[1], [0], [0], [1], [0, 0, 1, 1], [], []>} : vector<256x128xf32>, vector<128x128xf32>, vector<256x128xf32> -> vector<256x128xf32>
    %c0_8 = arith.constant 0 : index
    %c0_9 = arith.constant 0 : index
    %6 = vector.load %arg5[%c0_8, %c0_9] : memref<1x128xf32, #tpu.memory_space<vmem>>, vector<1x128xf32>
    %7 = vector.broadcast %6 : vector<1x128xf32> to vector<256x128xf32>
    %8 = arith.addf %5, %7 : vector<256x128xf32>
    %9 = math.tanh %8 : vector<256x128xf32>
    %10 = vector.shape_cast %9 : vector<256x128xf32> to vector<16x16x128xf32>
    %11 = vector.shape_cast %1 : vector<16x128xf32> to vector<16x1x128xf32>
    %12 = vector.broadcast %11 : vector<16x1x128xf32> to vector<16x16x128xf32>
    %13 = arith.mulf %10, %12 : vector<16x16x128xf32>
    %cst_10 = arith.constant dense<0.000000e+00> : vector<16x16xf32>
    %14 = vector.multi_reduction <add>, %13, %cst_10 [2] : vector<16x16x128xf32> to vector<16x16xf32>
    %c0_11 = arith.constant 0 : index
    %c0_12 = arith.constant 0 : index
    %15 = vector.load %arg3[%c0_11, %c0_12] : memref<16x16xf32, #tpu.memory_space<vmem>>, vector<16x16xf32>
    %cst_13 = arith.constant 0.000000e+00 : f32
    %16 = vector.broadcast %cst_13 : f32 to vector<16x16xf32>
    %17 = arith.cmpf one, %15, %16 : vector<16x16xf32>
    %cst_14 = arith.constant 0.000000e+00 : f32
    %18 = vector.broadcast %cst_14 : f32 to vector<16x16xf32>
    %19 = arith.select %17, %18, %14 : vector<16x16xi1>, vector<16x16xf32>
    %20 = math.exp %19 : vector<16x16xf32>
    %cst_15 = arith.constant dense<0.000000e+00> : vector<16xf32>
    %21 = vector.multi_reduction <add>, %20, %cst_15 [1] : vector<16x16xf32> to vector<16xf32>
    %22 = vector.shape_cast %21 : vector<16xf32> to vector<16x1xf32>
    %cst_16 = arith.constant 9.99999996E-13 : f32
    %23 = vector.broadcast %cst_16 : f32 to vector<16x1xf32>
    %24 = arith.addf %22, %23 : vector<16x1xf32>
    %25 = tpu.reciprocal %24 {approx = true} : vector<16x1xf32> -> vector<16x1xf32>
    %26 = vector.broadcast %25 : vector<16x1xf32> to vector<16x16xf32>
    %27 = arith.mulf %20, %26 : vector<16x16xf32>
    %28 = vector.shape_cast %27 : vector<16x16xf32> to vector<16x16x1xf32>
    %29 = vector.broadcast %28 : vector<16x16x1xf32> to vector<16x16x128xf32>
    %30 = arith.mulf %29, %0 : vector<16x16x128xf32>
    %cst_17 = arith.constant dense<0.000000e+00> : vector<16x128xf32>
    %31 = vector.multi_reduction <add>, %30, %cst_17 [1] : vector<16x16x128xf32> to vector<16x128xf32>
    %cst_18 = arith.constant dense<0.000000e+00> : vector<16x128xf32>
    %32 = tpu.matmul %31, %2, %cst_18 {dimension_numbers = #tpu.dot_dimension_numbers<[1], [0], [0], [1], [0, 0, 1, 1], [], []>} : vector<16x128xf32>, vector<128x128xf32>, vector<16x128xf32> -> vector<16x128xf32>
    %cst_19 = arith.constant 5.000000e-01 : f32
    %33 = vector.broadcast %cst_19 : f32 to vector<16x128xf32>
    %34 = arith.mulf %33, %1 : vector<16x128xf32>
    %cst_20 = arith.constant 5.000000e-01 : f32
    %35 = vector.broadcast %cst_20 : f32 to vector<16x128xf32>
    %36 = arith.mulf %35, %32 : vector<16x128xf32>
    %37 = arith.addf %34, %36 : vector<16x128xf32>
    %c0_21 = arith.constant 0 : index
    %c0_22 = arith.constant 0 : index
    %38 = vector.load %arg7[%c0_21, %c0_22] : memref<16x128xf32, #tpu.memory_space<vmem>>, vector<16x128xf32>
    tpu.vector_store %arg7[%c0_21, %c0_22], %37 {strides = array<i32>} : memref<16x128xf32, #tpu.memory_space<vmem>>, vector<16x128xf32>,
    return
  }
  func.func @transform_0(%arg0: i32) -> (i32, i32) {
    %c0_i32 = arith.constant 0 : i32
    %c0_i32_0 = arith.constant 0 : i32
    return %arg0, %c0_i32 : i32, i32
  }
  func.func @transform_1(%arg0: i32) -> (i32, i32, i32) {
    %c0_i32 = arith.constant 0 : i32
    %c0_i32_0 = arith.constant 0 : i32
    %c0_i32_1 = arith.constant 0 : i32
    return %arg0, %c0_i32, %c0_i32_0 : i32, i32, i32
  }
  func.func @transform_2(%arg0: i32) -> (i32, i32) {
    %c0_i32 = arith.constant 0 : i32
    %c0_i32_0 = arith.constant 0 : i32
    return %arg0, %c0_i32 : i32, i32
  }
  func.func @transform_3(%arg0: i32) -> (i32, i32) {
    %c0_i32 = arith.constant 0 : i32
    %c0_i32_0 = arith.constant 0 : i32
    %c0_i32_1 = arith.constant 0 : i32
    return %c0_i32, %c0_i32_0 : i32, i32
  }
  func.func @transform_4(%arg0: i32) -> (i32, i32) {
    %c0_i32 = arith.constant 0 : i32
    %c0_i32_0 = arith.constant 0 : i32
    %c0_i32_1 = arith.constant 0 : i32
    return %c0_i32, %c0_i32_0 : i32, i32
  }
  func.func @transform_5(%arg0: i32) -> (i32, i32) {
    %c0_i32 = arith.constant 0 : i32
    %c0_i32_0 = arith.constant 0 : i32
    %c0_i32_1 = arith.constant 0 : i32
    return %c0_i32, %c0_i32_0 : i32, i32
  }
  func.func @transform_6(%arg0: i32) -> (i32, i32) {
    %c0_i32 = arith.constant 0 : i32
    %c0_i32_0 = arith.constant 0 : i32
    return %arg0, %c0_i32 : i32, i32
  }
}

</mosaic_0001>

<bundles_post_ra>
// kernel: tpu_custom_call.1
= control target key start
LH: loop header
LB: loop body
LE: loop exit
PB: predicated region body
PF: predicated region fallthrough
CT: control target
= control target key end

     0   :  { %11 = vsyncpa [#allocation3], 0  ;;  %s2784_s0 = inlined_call_operand.vmem [shape: f32[64,128], index: 0, kind: input, shape index: {}]   ;;  %s2785_s1 = inlined_call_operand.hbm [shape: f32[64,16,128], index: 1, kind: input, shape index: {}]   ;;  %s2786_s2 = inlined_call_operand.vmem [shape: f32[64,16], index: 2, kind: input, shape index: {}]   ;;  %s2787_s3 = inlined_call_operand.hbm [shape: f32[128,128], index: 3, kind: input, shape index: {}]   ;;  %s2788_s4 = inlined_call_operand.vmem [shape: f32[1,128], index: 4, kind: input, shape index: {}]   ;;  %s2789_s5 = inlined_call_operand.hbm [shape: f32[128,128], index: 5, kind: input, shape index: {}]   ;;  %s2790_s6 = inlined_call_operand.hbm [shape: f32[64,128], index: 6, kind: output, shape index: {}]  }
   0x1   :  { %13 = vsyncpa [#allocation3 + $0x1], 0 }
   0x2   :  { %14 = vsyncpa [#allocation6], 0 }
   0x3   :  { %15 = vsyncpa [#allocation4], 0 }
   0x4   :  { %17 = vsyncpa [#allocation4 + $0x1], 0  ;;  %s2325_s21 = smov 0   ;;  %s2327_s22 = smov 0  }
   0x5   :  { %s2329_s23 = smov 0   ;;  %s2331_s24 = smov 0  }
   0x6 LB: > { %s2346_s25 = sadd.s32 4294967295, %s2279_s24   ;;  %s1743_s26 = sadd.s32 4294967294, %s2279_s24   ;;  %s2279_s24 = sphi %s2331_s24, %s2814_s24   ;;  %s2275_s23 = sphi %s2329_s23, %s2813_s23   ;;  %s2271_s22 = sphi %s2327_s22, %s2812_s22   ;;  %s2267_s21 = sphi %s2325_s21, %s2811_s21  }
   0x7   : > { %p69_p0 = scmp.ne.s32.totalorder %s2271_s22, %s2267_s21  ;;  %p2791_p1 = scmp.eq.s32.totalorder %s2346_s25, 0 }
   0x8   : > { %p182_p2 = scmp.eq.s32.totalorder %s2346_s25, 3  ;;  %p188_p3 = scmp.eq.s32.totalorder %s1743_s26, 3 }
   0x9   : > { %p2355_p4 = por %p2791_p1, %p69_p0  ;;  %p1744_p5 = scmp.ge.s32.totalorder %s2279_s24, 1 }
   0xa   : > { %p2360_p6 = por %p188_p3, %p69_p0  ;;  %p195_p7 = scmp.lt.s32.totalorder %s2279_s24, 5 }
   0xb   : > { %s2797_s27 = scalar_select %p2355_p4, 1, 0 }
   0xc   : > { %s2798_s28 = scalar_select %p2360_p6, 1, 0 }
   0xd   : > { %p2365_p8 = pnand %p1744_p5, %p195_p7  ;;  %s2281_s30 = smov [#allocation5]  }
   0xe   : > { %s207_s7 = sshll.u32 %s2281_s30, 4  ;;  %s2282_s9 = smov [#allocation7]   ;;  %s208_s7 = int_to_ptr.vmem [resolvable:$true] %s207_s7 }
   0xf   : > { %s2799_s29 = scalar_select %p2365_p8, 1, 0 }
  0x10   : > { %p1963_p9 = pneg %p2365_p8  ;;  %s223_s10 = sshll.u32 %s2282_s9, 4  ;;  %s224_s10 = int_to_ptr.vmem [resolvable:$true] %s223_s10 }
  0x11   : > { %s2142_s11 = scalar_lea.vmem %s208_s7, 2048  ;;  %p2150_p3 = scmp.lt.s32.totalorder %s208_s7, %s208_s7 }
  0x12   : > { %p2373_p10 = pnand %p1963_p9, %p2791_p1  ;;  %p2143_p12 = scmp.ne.s32.totalorder %s208_s7, %s2142_s11 }
  0x13   : > { %p2151_p5 = scmp.lt.s32.totalorder %s2142_s11, %s2142_s11 }
  0x14   : > { %p2133_p11 = pneg %p2373_p10 }
  0x15   : > { %p2152_p7 = por %p2151_p5, %p2150_p3 }
  0x16   : > { %p2145_p13 = pnand %p2143_p12, %p2133_p11 }
  0x18   : > { %p2146_p0 = pneg %p2145_p13 }
  0x1a   : > { %p2153_p9 = pnand %p2152_p7, %p2146_p0 }
  0x1c   : > { %2156 = shalt.err (!%p2153_p9)
}
  0x1d   : > { %s2792_s12 = smov 128   ;;  %s2793_s13 = smov 8  }
  0x1e   : > { %1966 = dma.hbm_to_vmem [thread:$0]  (!%p2373_p10), %s2787_s3, 2048, %s208_s7, [#allocation6], %s2792_s12, %s2792_s12, %s2793_s13  }
  0x1f   : > { %s2168_s16 = scalar_lea.vmem %s224_s10, 2048  ;;  %p2176_p0 = scmp.lt.s32.totalorder %s224_s10, %s224_s10 }
  0x20   : > { %p2169_p12 = scmp.ne.s32.totalorder %s224_s10, %s2168_s16  ;;  %p2177_p5 = scmp.lt.s32.totalorder %s2168_s16, %s2168_s16 }
  0x22   : > { %p2171_p13 = pnand %p2169_p12, %p2133_p11  ;;  %p2178_p7 = por %p2177_p5, %p2176_p0 }
  0x24   : > { %p2172_p3 = pneg %p2171_p13 }
  0x26   : > { %p2179_p9 = pnand %p2178_p7, %p2172_p3 }
  0x28   : > { %2182 = shalt.err (!%p2179_p9)
}
  0x29   : > { %1969 = dma.hbm_to_vmem [thread:$0]  (!%p2373_p10), %s2789_s5, 2048, %s224_s10, [#allocation6], %s2792_s12, %s2792_s12, %s2793_s13  }
  0x2a   : > { %s2402_s19 = sadd.s32 1, %s2279_s24   ;;  %s56_s20 = sadd.s32 1, %s2275_s23 }
  0x2b   : > { %s53_s26 = ssub.s32 %s2279_s24, %s2402_s19  ;;  %p63_p11 = scmp.ne.s32.totalorder %s2275_s23, %s2271_s22 }
  0x2c   : > { %p54_p12 = scmp.eq.s32.totalorder %s53_s26, 0  ;;  %p64_p13 = scmp.eq.s32.totalorder %s2279_s24, 0 }
  0x2d   : > { %p2412_p3 = por %p182_p2, %p63_p11  ;;  %p1980_p0 = scmp.lt.s32.totalorder %s2279_s24, 4 }
  0x2e   : > { %s2418_s7 = scalar_select %p54_p12, %s2275_s23, %s56_s20  }
  0x2f   : > { %s2801_s30 = scalar_select %p2412_p3, 1, 0 }
  0x30   : > { %p65_p5 = por %p64_p13, %p63_p11  ;;  %s246_s8 = sand.u32 1, %s2275_s23  }
  0x31   : > { %s1748_s9 = sshll.u32 %s246_s8, 8  ;;  %s1768_s10 = sshll.u32 %s2279_s24, 12 }
  0x32   : > { %s2425_s15 = scalar_lea.hbm %s2785_s1, %s1768_s10  ;;  %s250_s16 = scalar_lea.vmem [#allocation2], %s1748_s9 }
  0x33   : > { %s258_s17 = sshll.u32 %s250_s16, 4  ;;  %p2429_p2 = pnand %p1980_p0, %p65_p5  ;;  %s2427_s17 = int_to_ptr.vmem [resolvable:$true] %s258_s17 }
  0x34   : > { %s2433_s20 = scalar_lea.sflag [#allocation3], %s246_s8  ;;  %s2183_s26 = scalar_lea.hbm %s2425_s15, 4096 }
  0x35   : > { %p2184_p10 = scmp.ne.s32.totalorder %s2425_s15, %s2183_s26  ;;  %p2185_p7 = pneg %p2429_p2 }
  0x36   : > { %s2188_s9 = scalar_lea.hbm %s2785_s1, 16384  ;;  %p2189_p12 = scmp.lt.s32.totalorder %s2425_s15, %s2785_s1 }
  0x37   : > { %p2186_p9 = pnand %p2185_p7, %p2184_p10  ;;  %p2190_p13 = scmp.lt.s32.totalorder %s2188_s9, %s2183_s26 }
  0x39   : > { %p2187_p11 = pneg %p2186_p9  ;;  %p2191_p0 = por %p2190_p13, %p2189_p12 }
  0x3b   : > { %p2192_p5 = pnand %p2191_p0, %p2187_p11 }
  0x3d   : > { %2195 = shalt.err (!%p2192_p5)
}
  0x3e   : > { %s2196_s8 = scalar_lea.vmem %s2427_s17, 4096  ;;  %s2285_s12 = smov [#allocation2]  }
  0x3f   : > { %p2197_p1 = scmp.ne.s32.totalorder %s2427_s17, %s2196_s8  ;;  %s2201_s13 = sshll.u32 %s2285_s12, 4  ;;  %s2202_s13 = int_to_ptr.vmem [resolvable:$false] %s2201_s13 }
  0x40   : > { %s2203_s10 = scalar_lea.vmem %s2202_s13, 8192  ;;  %p2204_p9 = scmp.lt.s32.totalorder %s2427_s17, %s2202_s13 }
  0x41   : > { %p2199_p6 = pnand %p2197_p1, %p2185_p7  ;;  %p2205_p3 = scmp.lt.s32.totalorder %s2203_s10, %s2196_s8 }
  0x43   : > { %p2200_p10 = pneg %p2199_p6  ;;  %p2206_p4 = por %p2205_p3, %p2204_p9 }
  0x45   : > { %p2207_p8 = pnand %p2206_p4, %p2200_p10 }
  0x47   : > { %2210 = shalt.err (!%p2207_p8)
}
  0x48   : > { %s2803_s26 = smov 8   ;;  %s2804_s11 = smov 128  }
  0x49   : > { %1973 = dma.hbm_to_vmem [thread:$0]  (!%p2429_p2), %s2425_s15, 4096, %s2427_s17, %s2433_s20, %s2804_s11, %s2804_s11, %s2803_s26  }
  0x4a   : > { %p2805_p1 = scmp.ne.s32.totalorder %s2799_s29, 0 }
  0x4b   : > { %s2460_s12 = sand.u32 (!%p2805_p1), 1, %s2271_s22   ;;  %p2806_p4 = scmp.ne.s32.totalorder (!%p2805_p1), %s2797_s27, 0 }
  0x4c   : > { %279 = sbr.rel (%p2805_p1) target bundleno = 1088 (0x440), region = 44  ;;  %s1753_s13 = sshll.u32 (!%p2805_p1), %s2460_s12, 8 }
  0x4d   : > { %s282_s9 = scalar_lea.sflag (!%p2805_p1), [#allocation3], %s2460_s12  ;;  %s2464_s14 = scalar_lea.vmem (!%p2805_p1), [#allocation2], %s1753_s13 }
  0x51   : > { %2254 = dma.done.wait (%p2806_p4), %s282_s9, 4096  }
  0x52   : > { %2256 = vsyncadd (%p2806_p4), %s282_s9, 4294963200  ;;  %p2807_p6 = scmp.eq.s32.totalorder %s2346_s25, 0 }
  0x54   : > { %2258 = dma.done.wait (%p2807_p6), [#allocation6], 4096   ;;  %p2808_p8 = pmov %p2807_p6 }
  0x55   : > { %v411_v0 = vld [vmem:[#allocation5 + $0x78] sm:$0xff]  ;;  %v410_v1 = vld [vmem:[#allocation5 + $0x70] sm:$0xff]  ;;  %v409_v2 = vld [vmem:[#allocation5 + $0x68] sm:$0xff]  ;;  %s1757_s27 = sshll.u32 %s2346_s25, 1  ;;  %v2286_v48 = vmov 1966171168   ;;  %v682_v50 = vlaneseq }
  0x56   : > { %2260 = vsyncadd (%p2808_p8), [#allocation6], 4294963200  ;;  %1836 = vmatprep.subr.mxu0 %v411_v0  ;;  %v408_v3 = vld [vmem:[#allocation5 + $0x60] sm:$0xff]  ;;  %v407_v5 = vld [vmem:[#allocation5 + $0x58] sm:$0xff]  ;;  %p333_p3 = scmp.lt.s32.totalorder %s1757_s27, 7  ;;  %v680_v49 = vunpack.c.l.s4 %v2286_v48  ;;  %vm999_vm0 = vcmask 130112  }
  0x57   : > { %1837 = vmatpush3.msra.mxu0 %v411_v0  ;;  %v346_v4 = vld [vmem:[%s2464_s14] sm:$0xff]  ;;  %v406_v6 = vld [vmem:[#allocation5 + $0x50] sm:$0xff]  ;;  %v405_v7 = vld [vmem:[#allocation5 + $0x48] sm:$0xff]  ;;  %v2511_v52 = vshrl.u32 %v682_v50, 7  ;;  %vm1136_vm1 = vcmask 1041409   ;;  %vm1138_vm2 = vcmask 1042434  }
  0x58   : > { %1838 = vmatprep.subr.mxu0 %v410_v1  ;;  %1868 = vmatprep.mubr.f32.mxu0 %v346_v4  ;;  %v404_v8 = vld [vmem:[#allocation5 + $0x40] sm:$0xff]  ;;  %v403_v9 = vld [vmem:[#allocation5 + $0x38] sm:$0xff]  ;;  %v402_v10 = vld [vmem:[#allocation5 + $0x30] sm:$0xff]  ;;  %s2816_s27 = smov (!%p333_p3, %s1757_s27), 7  ;;  %v681_v51 = vunpack.c.0.s8 %v680_v49  ;;  %vm1140_vm3 = vcmask 1043459   ;;  %vm1142_vm4 = vcmask 1044484  }
  0x59   : > { %1839 = vmatpush3.msra.mxu0 %v410_v1  ;;  %v401_v11 = vld [vmem:[#allocation5 + $0x28] sm:$0xff]  ;;  %v400_v12 = vld [vmem:[#allocation5 + $0x20] sm:$0xff]  ;;  %v399_v13 = vld [vmem:[#allocation5 + $0x18] sm:$0xff]  ;;  %s1758_s29 = sshll.u32 %s2816_s27, 3  ;;  %v2537_v4 = vsub.s32 0, %v2511_v52  ;;  %vm1144_vm5 = vcmask 1045509  }
  0x5a   : > { %1840 = vmatprep.subr.mxu0 %v409_v2  ;;  %v398_v14 = vld [vmem:[#allocation5 + $0x10] sm:$0xff]  ;;  %v397_v15 = vld [vmem:[#allocation5 + $0x8] sm:$0xff]  ;;  %v396_v16 = vld [vmem:[#allocation5] sm:$0xff]  ;;  %s2523_s16 = scalar_lea.vmem %s2784_s0, %s1758_s29  ;;  %v2526_v55 = vsub.s32 %v681_v51, %v2511_v52  ;;  %s2623_s26 = scalar_lea.vmem %s2786_s2, %s1758_s29  ;;  %vm1146_vm6 = vcmask 1046534   ;;  %vm1148_vm7 = vcmask 1047559   ;;  %vm1165_vm9 = vcmask 130048  }
  0x5b   : > { %1841 = vmatpush3.msra.mxu0 %v409_v2  ;;  %v347_v17 = vld [vmem:[%s2464_s14 + $0x8] sm:$0xff]  ;;  %v348_v18 = vld [vmem:[%s2464_s14 + $0x10] sm:$0xff]  ;;  %v349_v19 = vld [vmem:[%s2464_s14 + $0x18] sm:$0xff]  ;;  %s1756_s11 = sshll.u32 %s2460_s12, 4  ;;  %s1614_s17 = scalar_lea.sflag [#allocation4], %s2460_s12 }
  0x5c   : > { %1842 = vmatprep.subr.mxu0 %v408_v3  ;;  %v350_v20 = vld [vmem:[%s2464_s14 + $0x20] sm:$0xff]  ;;  %v351_v21 = vld [vmem:[%s2464_s14 + $0x28] sm:$0xff]  ;;  %v352_v22 = vld [vmem:[%s2464_s14 + $0x30] sm:$0xff]  ;;  %s331_s13 = scalar_lea.vmem [#allocation8], %s1756_s11  ;;  %p2809_p7 = scmp.ne.s32.totalorder %s2801_s30, 0 }
  0x5d   : > { %1843 = vmatpush3.msra.mxu0 %v408_v3  ;;  %v353_v23 = vld [vmem:[%s2464_s14 + $0x38] sm:$0xff]  ;;  %v354_v24 = vld [vmem:[%s2464_s14 + $0x40] sm:$0xff]  ;;  %v355_v25 = vld [vmem:[%s2464_s14 + $0x48] sm:$0xff]  ;;  %s1627_s9 = sshll.u32 %s331_s13, 4  ;;  %s2737_s9 = int_to_ptr.vmem [resolvable:$true] %s1627_s9 }
  0x5e   : > { %1844 = vmatprep.subr.mxu0 %v407_v5  ;;  %v356_v26 = vld [vmem:[%s2464_s14 + $0x50] sm:$0xff]  ;;  %v357_v27 = vld [vmem:[%s2464_s14 + $0x58] sm:$0xff]  ;;  %v358_v28 = vld [vmem:[%s2464_s14 + $0x60] sm:$0xff]  ;;  %s2211_s18 = scalar_lea.vmem %s2737_s9, 256 }
  0x5f   : > { %1845 = vmatpush3.msra.mxu0 %v407_v5  ;;  %v359_v29 = vld [vmem:[%s2464_s14 + $0x68] sm:$0xff]  ;;  %v360_v30 = vld [vmem:[%s2464_s14 + $0x70] sm:$0xff]  ;;  %v361_v31 = vld [vmem:[%s2464_s14 + $0x78] sm:$0xff]  ;;  %p2212_p2 = scmp.ne.s32.totalorder %s2737_s9, %s2211_s18 }
  0x60   : > { %1846 = vmatprep.subr.mxu0 %v406_v6  ;;  %v362_v32 = vld [vmem:[%s2464_s14 + $0x80] sm:$0xff]  ;;  %v363_v33 = vld [vmem:[%s2464_s14 + $0x88] sm:$0xff]  ;;  %v364_v34 = vld [vmem:[%s2464_s14 + $0x90] sm:$0xff] }
  0x61   : > { %1847 = vmatpush3.msra.mxu0 %v406_v6  ;;  %v365_v35 = vld [vmem:[%s2464_s14 + $0x98] sm:$0xff]  ;;  %v366_v36 = vld [vmem:[%s2464_s14 + $0xa0] sm:$0xff]  ;;  %v367_v37 = vld [vmem:[%s2464_s14 + $0xa8] sm:$0xff]  ;;  %p2213_p11 = pnand %p2212_p2, %p2809_p7 }
  0x62   : > { %1848 = vmatprep.subr.mxu0 %v405_v7  ;;  %v368_v38 = vld [vmem:[%s2464_s14 + $0xb0] sm:$0xff]  ;;  %v369_v39 = vld [vmem:[%s2464_s14 + $0xb8] sm:$0xff]  ;;  %v370_v40 = vld [vmem:[%s2464_s14 + $0xc0] sm:$0xff] }
  0x63   : > { %1849 = vmatpush3.msra.mxu0 %v405_v7  ;;  %v371_v41 = vld [vmem:[%s2464_s14 + $0xc8] sm:$0xff]  ;;  %v372_v42 = vld [vmem:[%s2464_s14 + $0xd0] sm:$0xff]  ;;  %v373_v43 = vld [vmem:[%s2464_s14 + $0xd8] sm:$0xff]  ;;  %p2214_p12 = pneg %p2213_p11 }
  0x64   : > { %1850 = vmatprep.subr.mxu0 %v404_v8  ;;  %v374_v44 = vld [vmem:[%s2464_s14 + $0xe0] sm:$0xff]  ;;  %v375_v45 = vld [vmem:[%s2464_s14 + $0xe8] sm:$0xff]  ;;  %v376_v46 = vld [vmem:[%s2464_s14 + $0xf0] sm:$0xff] }
  0x65   : > { %1851 = vmatpush3.msra.mxu0 %v404_v8  ;;  %v377_v47 = vld [vmem:[%s2464_s14 + $0xf8] sm:$0xff]  ;;  %v2516_v53 = vld [vmem:[%s2788_s4] ss:$0 sm:$0xff] }
  0x66   : > { %1852 = vmatprep.subr.mxu0 %v403_v9  ;;  %v378_v57 = vld [vmem:[%s2523_s16] sm:$0xff] }
  0x67   : > { %1853 = vmatpush3.msra.mxu0 %v403_v9  ;;  %v685_v61 = vrot.slane %v378_v57, %v2526_v55 }
  0x68   : > { %1854 = vmatprep.subr.mxu0 %v402_v10 }
  0x69   : > { %1855 = vmatpush3.msra.mxu0 %v402_v10  ;;  %v701_v2 = vrot.slane %v685_v61, %v2526_v55  ;;  %v693_v5 = vcombine.high %v685_v61, %v685_v61 }
  0x6a   : > { %1856 = vmatprep.subr.mxu0 %v401_v11 }
  0x6b   : > { %1857 = vmatpush3.msra.mxu0 %v401_v11  ;;  %v779_v10 = vrot.slane %v701_v2, %v2537_v4  ;;  %v715_v11 = vrot.slane %v693_v5, %v2526_v55 }
  0x6c   : > { %1858 = vmatprep.subr.mxu0 %v400_v12 }
  0x6d   : > { %1859 = vmatpush3.msra.mxu0 %v400_v12 }
  0x6e   : > { %1860 = vmatprep.subr.mxu0 %v399_v13 }
  0x6f   : > { %1861 = vmatpush3.msra.mxu0 %v399_v13 }
  0x70   : > { %1862 = vmatprep.subr.mxu0 %v398_v14 }
  0x71   : > { %1863 = vmatpush3.msra.mxu0 %v398_v14 }
  0x72   : > { %1864 = vmatprep.subr.mxu0 %v397_v15 }
  0x73   : > { %1865 = vmatpush3.msra.mxu0 %v397_v15 }
  0x74   : > { %1866 = vmatprep.subr.mxu0 %v396_v16 }
  0x75   : > { %1867 = vmatpush3.msra.mxu0 %v396_v16 }
  0x76   : > { %1869 = vmatmul.mubr.f32.vlgmr.msra.gmra.mxu0 %v347_v17 }
  0x77   : > { %1871 = vmatprep.mubr.f32.mxu0 %v348_v18  ;;  %v783_v18 = vrot.slane %v715_v11, %v2537_v4 }
  0x7a   : > { %1872 = vmatmul.mubr.f32.gmra.mxu0 %v349_v19 }
  0x7b   : > { %1874 = vmatprep.mubr.f32.mxu0 %v350_v20 }
  0x7e   : > { %1875 = vmatmul.mubr.f32.gmra.mxu0 %v351_v21 }
  0x7f   : > { %1877 = vmatprep.mubr.f32.mxu0 %v352_v22  ;;  %v723_v22 = vcombine.high %v701_v2, %v701_v2 }
  0x82   : > { %1878 = vmatmul.mubr.f32.gmra.mxu0 %v353_v23  ;;  %v678_v23 = vcombine.high %v378_v57, %v378_v57 }
  0x83   : > { %1880 = vmatprep.mubr.f32.mxu0 %v354_v24 }
  0x86   : > { %1881 = vmatmul.mubr.f32.gmra.mxu0 %v355_v25 }
  0x87   : > { %1883 = vmatprep.mubr.f32.mxu0 %v356_v26 }
  0x8a   : > { %1884 = vmatmul.mubr.f32.gmra.mxu0 %v357_v27 }
  0x8b   : > { %1886 = vmatprep.mubr.f32.mxu0 %v358_v28 }
  0x8e   : > { %1887 = vmatmul.mubr.f32.gmra.mxu0 %v359_v29 }
  0x8f   : > { %1889 = vmatprep.mubr.f32.mxu0 %v360_v30 }
  0x92   : > { %1890 = vmatmul.mubr.f32.gmra.mxu0 %v361_v31  ;;  %v725_v31 = vcombine.high %v715_v11, %v715_v11 }
  0x93   : > { %1892 = vmatprep.mubr.f32.mxu0 %v362_v32 }
  0x96   : > { %1893 = vmatmul.mubr.f32.gmra.mxu0 %v363_v33  ;;  %v787_v33 = vrot.slane %v723_v22, %v2537_v4 }
  0x97   : > { %1895 = vmatprep.mubr.f32.mxu0 %v364_v34  ;;  %v692_v34 = vrot.slane %v678_v23, %v2526_v55 }
  0x9a   : > { %1896 = vmatmul.mubr.f32.gmra.mxu0 %v365_v35 }
  0x9b   : > { %1898 = vmatprep.mubr.f32.mxu0 %v366_v36 }
  0x9e   : > { %1899 = vmatmul.mubr.f32.gmra.mxu0 %v367_v37 }
  0x9f   : > { %1901 = vmatprep.mubr.f32.mxu0 %v368_v38 }
  0xa2   : > { %1902 = vmatmul.mubr.f32.gmra.mxu0 %v369_v39 }
  0xa3   : > { %1904 = vmatprep.mubr.f32.mxu0 %v370_v40 }
  0xa6   : > { %1905 = vmatmul.mubr.f32.gmra.mxu0 %v371_v41  ;;  %v791_v41 = vrot.slane %v725_v31, %v2537_v4 }
  0xa7   : > { %1907 = vmatprep.mubr.f32.mxu0 %v372_v42 }
  0xaa   : > { %1908 = vmatmul.mubr.f32.gmra.mxu0 %v373_v43 }
  0xab   : > { %1910 = vmatprep.mubr.f32.mxu0 %v374_v44  ;;  %v708_v44 = vrot.slane %v692_v34, %v2526_v55 }
  0xad   : > { %v724_v2 = vcombine.high %v708_v44, %v708_v44 }
  0xae   : > { %1911 = vmatmul.mubr.f32.gmra.mxu0 %v375_v45  ;;  %v694_v45 = vcombine.high %v692_v34, %v692_v34 }
  0xaf   : > { %1913 = vmatprep.mubr.f32.mxu0 %v376_v46 }
  0xb2   : > { %1914 = vmatmul.mubr.f32.gmra.mxu0 %v377_v47 }
 0x136   : > { %v1870_v54 = vpop.f32.mrf.mxu0 }
 0x137   : > { %v491_v56 = vadd.f32 %v1870_v54, %v2516_v53 }
 0x138   : > { %v485_v58 = vpop.f32.mrf.mxu0 }
 0x139   : > { %2025 = vtanh.f32 %v491_v56  ;;  %v486_v59 = vadd.f32 %v2516_v53, %v485_v58  ;;  %v795_v58 = vrot.slane %v708_v44, %v2537_v4 }
 0x13a   : > { %v1873_v60 = vpop.f32.mrf.mxu0 }
 0x13b   : > { %2027 = vtanh.f32 %v486_v59  ;;  %v501_v62 = vadd.f32 %v1873_v60, %v2516_v53  ;;  %v722_v59 = vrot.slane %v694_v45, %v2526_v55 }
 0x13c   : > { %v495_v63 = vpop.f32.mrf.mxu0 }
 0x13d   : > { %2029 = vtanh.f32 %v501_v62  ;;  %v496_v0 = vadd.f32 %v2516_v53, %v495_v63 }
 0x13e   : > { %v1876_v1 = vpop.f32.mrf.mxu0 }
 0x13f   : > { %2031 = vtanh.f32 %v496_v0  ;;  %v511_v3 = vadd.f32 %v1876_v1, %v2516_v53 }
 0x140   : > { %v505_v6 = vpop.f32.mrf.mxu0 }
 0x141   : > { %v506_v7 = vadd.f32 %v2516_v53, %v505_v6  ;;  %2033 = vtanh.f32 %v511_v3  ;;  %v799_v6 = vrot.slane %v722_v59, %v2537_v4 }
 0x142   : > { %v1879_v8 = vpop.f32.mrf.mxu0 }
 0x143   : > { %2035 = vtanh.f32 %v506_v7  ;;  %v521_v9 = vadd.f32 %v1879_v8, %v2516_v53  ;;  %v2563_v8 = vld [vmem:[%s2523_s16 + $0x8] sm:$0xff] }
 0x144   : > { %v515_v12 = vpop.f32.mrf.mxu0 }
 0x145   : > { %v516_v13 = vadd.f32 %v2516_v53, %v515_v12  ;;  %2037 = vtanh.f32 %v521_v9 }
 0x146   : > { %v2026_v14 = vpop.eup %2025  ;;  %v1882_v15 = vpop.f32.mrf.mxu0 }
 0x147   : > { %2039 = vtanh.f32 %v516_v13  ;;  %v531_v16 = vadd.f32 %v1882_v15, %v2516_v53  ;;  %v857_v17 = vmul.f32 %v2026_v14, %v779_v10  ;;  %v803_v14 = vrot.slane %v724_v2, %v2537_v4 }
 0x148   : > { %v2028_v19 = vpop.eup %2027  ;;  %v525_v20 = vpop.f32.mrf.mxu0  ;;  %v726_v15 = vcombine.high %v722_v59, %v722_v59 }
 0x149   : > { %v526_v21 = vadd.f32 %v2516_v53, %v525_v20  ;;  %890 = vadd.xlane.f32.xlu0 %v857_v17  ;;  %2041 = vtanh.f32 %v531_v16  ;;  %v856_v28 = vmul.f32 %v2028_v19, %v779_v10 }
 0x14a   : > { %v2030_v24 = vpop.eup %2029  ;;  %v1885_v25 = vpop.f32.mrf.mxu0 }
 0x14b   : > { %2043 = vtanh.f32 %v526_v21  ;;  %v541_v26 = vadd.f32 %v1885_v25, %v2516_v53  ;;  %v859_v27 = vmul.f32 %v2030_v24, %v783_v18  ;;  %v807_v25 = vrot.slane %v726_v15, %v2537_v4 }
 0x14c   : > { %v2032_v29 = vpop.eup %2031  ;;  %v535_v30 = vpop.f32.mrf.mxu0 }
 0x14d   : > { %v536_v32 = vadd.f32 %v2516_v53, %v535_v30  ;;  %894 = vadd.xlane.f32.xlu1 %v859_v27  ;;  %888 = vadd.xlane.f32.xlu0 %v856_v28  ;;  %2045 = vtanh.f32 %v541_v26  ;;  %v858_v38 = vmul.f32 %v2032_v29, %v783_v18  ;;  %v734_v18 = vrot.slane %v2563_v8, %v2526_v55 }
 0x14e   : > { %v1888_v35 = vpop.f32.mrf.mxu0  ;;  %v2034_v36 = vpop.eup %2033 }
 0x14f   : > { %2047 = vtanh.f32 %v536_v32  ;;  %v551_v37 = vadd.f32 %v1888_v35, %v2516_v53  ;;  %v861_v49 = vmul.f32 %v2034_v36, %v787_v33  ;;  %v742_v26 = vcombine.high %v734_v18, %v734_v18 }
 0x150   : > { %v2036_v39 = vpop.eup %2035  ;;  %v545_v40 = vpop.f32.mrf.mxu0  ;;  %v750_v29 = vrot.slane %v734_v18, %v2526_v55 }
 0x151   : > { %v546_v42 = vadd.f32 %v2516_v53, %v545_v40  ;;  %892 = vadd.xlane.f32.xlu1 %v858_v38  ;;  %v860_v43 = vmul.f32 %v2036_v39, %v787_v33  ;;  %2049 = vtanh.f32 %v551_v37  ;;  %v764_v36 = vrot.slane %v742_v26, %v2526_v55 }
 0x152   : > { %v1891_v46 = vpop.f32.mrf.mxu0  ;;  %v2038_v47 = vpop.eup %2037  ;;  %v811_v39 = vrot.slane %v750_v29, %v2537_v4 }
 0x153   : > { %2051 = vtanh.f32 %v546_v42  ;;  %v561_v48 = vadd.f32 %v1891_v46, %v2516_v53  ;;  %896 = vadd.xlane.f32.xlu0 %v860_v43  ;;  %v863_v63 = vmul.f32 %v2038_v47, %v791_v41  ;;  %v815_v46 = vrot.slane %v764_v36, %v2537_v4 }
 0x154   : > { %v2040_v51 = vpop.eup %2039  ;;  %v555_v54 = vpop.f32.mrf.mxu0  ;;  %v772_v47 = vcombine.high %v750_v29, %v750_v29 }
 0x155   : > { %v556_v56 = vadd.f32 %v2516_v53, %v555_v54  ;;  %898 = vadd.xlane.f32.xlu1 %v861_v49  ;;  %v862_v57 = vmul.f32 %v2040_v51, %v791_v41  ;;  %2053 = vtanh.f32 %v561_v48  ;;  %v727_v48 = vcombine.high %v2563_v8, %v2563_v8 }
 0x156   : > { %v1894_v60 = vpop.f32.mrf.mxu0  ;;  %v2042_v61 = vpop.eup %2041 }
 0x157   : > { %2055 = vtanh.f32 %v556_v56  ;;  %900 = vadd.xlane.f32.xlu0 %v862_v57  ;;  %v571_v62 = vadd.f32 %v1894_v60, %v2516_v53  ;;  %v865_v11 = vmul.f32 %v2042_v61, %v795_v58  ;;  %v819_v61 = vrot.slane %v772_v47, %v2537_v4 }
 0x158   : > { %v2044_v0 = vpop.eup %2043  ;;  %v565_v1 = vpop.f32.mrf.mxu0 }
 0x159   : > { %2057 = vtanh.f32 %v571_v62  ;;  %902 = vadd.xlane.f32.xlu1 %v863_v63  ;;  %v566_v3 = vadd.f32 %v2516_v53, %v565_v1  ;;  %v864_v5 = vmul.f32 %v2044_v0, %v795_v58  ;;  %v774_v62 = vcombine.high %v764_v36, %v764_v36 }
 0x15a   : > { %v1897_v7 = vpop.f32.mrf.mxu0  ;;  %v2046_v9 = vpop.eup %2045  ;;  %v741_v63 = vrot.slane %v727_v48, %v2526_v55 }
 0x15b   : > { %2059 = vtanh.f32 %v566_v3  ;;  %904 = vadd.xlane.f32.xlu0 %v864_v5  ;;  %v581_v10 = vadd.f32 %v1897_v7, %v2516_v53  ;;  %v867_v22 = vmul.f32 %v2046_v9, %v799_v6  ;;  %v823_v9 = vrot.slane %v774_v62, %v2537_v4 }
 0x15c   : > { %v2048_v12 = vpop.eup %2047  ;;  %v575_v13 = vpop.f32.mrf.mxu0 }
 0x15d   : > { %2061 = vtanh.f32 %v581_v10  ;;  %906 = vadd.xlane.f32.xlu1 %v865_v11  ;;  %v576_v16 = vadd.f32 %v2516_v53, %v575_v13  ;;  %v866_v17 = vmul.f32 %v2048_v12, %v799_v6  ;;  %v757_v10 = vrot.slane %v741_v63, %v2526_v55 }
 0x15e   : > { %v1900_v19 = vpop.f32.mrf.mxu0  ;;  %v2050_v20 = vpop.eup %2049  ;;  %v743_v11 = vcombine.high %v741_v63, %v741_v63 }
 0x15f   : > { %2063 = vtanh.f32 %v576_v16  ;;  %908 = vadd.xlane.f32.xlu0 %v866_v17  ;;  %v591_v21 = vadd.f32 %v1900_v19, %v2516_v53  ;;  %v869_v33 = vmul.f32 %v2050_v20, %v803_v14  ;;  %v827_v20 = vrot.slane %v757_v10, %v2537_v4 }
 0x160   : > { %v2052_v23 = vpop.eup %2051  ;;  %v585_v24 = vpop.f32.mrf.mxu0 }
 0x161   : > { %2065 = vtanh.f32 %v591_v21  ;;  %910 = vadd.xlane.f32.xlu1 %v867_v22  ;;  %v586_v27 = vadd.f32 %v2516_v53, %v585_v24  ;;  %v868_v28 = vmul.f32 %v2052_v23, %v803_v14  ;;  %v771_v21 = vrot.slane %v743_v11, %v2526_v55 }
 0x162   : > { %v1903_v30 = vpop.f32.mrf.mxu0  ;;  %v2054_v31 = vpop.eup %2053 }
 0x163   : > { %2067 = vtanh.f32 %v586_v27  ;;  %912 = vadd.xlane.f32.xlu0 %v868_v28  ;;  %v601_v32 = vadd.f32 %v1903_v30, %v2516_v53  ;;  %v871_v43 = vmul.f32 %v2054_v31, %v807_v25  ;;  %v831_v29 = vrot.slane %v771_v21, %v2537_v4 }
 0x164   : > { %v2056_v34 = vpop.eup %2055  ;;  %v595_v35 = vpop.f32.mrf.mxu0  ;;  %v773_v30 = vcombine.high %v757_v10, %v757_v10 }
 0x165   : > { %2069 = vtanh.f32 %v601_v32  ;;  %914 = vadd.xlane.f32.xlu1 %v869_v33  ;;  %v596_v37 = vadd.f32 %v2516_v53, %v595_v35  ;;  %v870_v38 = vmul.f32 %v2056_v34, %v807_v25  ;;  %v775_v34 = vcombine.high %v771_v21, %v771_v21 }
 0x166   : > { %v2058_v40 = vpop.eup %2057  ;;  %v1906_v41 = vpop.f32.mrf.mxu0 }
 0x167   : > { %2071 = vtanh.f32 %v596_v37  ;;  %916 = vadd.xlane.f32.xlu0 %v870_v38  ;;  %v611_v42 = vadd.f32 %v1906_v41, %v2516_v53  ;;  %v873_v51 = vmul.f32 %v2058_v40, %v811_v39 }
 0x168   : > { %v2060_v44 = vpop.eup %2059  ;;  %v605_v45 = vpop.f32.mrf.mxu0 }
 0x169   : > { %2073 = vtanh.f32 %v611_v42  ;;  %918 = vadd.xlane.f32.xlu1 %v871_v43  ;;  %v606_v49 = vadd.f32 %v2516_v53, %v605_v45  ;;  %v872_v54 = vmul.f32 %v2060_v44, %v811_v39  ;;  %v839_v39 = vrot.slane %v775_v34, %v2537_v4 }
 0x16a   : > { %v2062_v56 = vpop.eup %2061  ;;  %v1909_v57 = vpop.f32.mrf.mxu0 }
 0x16b   : > { %2075 = vtanh.f32 %v606_v49  ;;  %v621_v58 = vadd.f32 %v1909_v57, %v2516_v53  ;;  %920 = vadd.xlane.f32.xlu0 %v872_v54  ;;  %v875_v1 = vmul.f32 %v2062_v56, %v815_v46 }
 0x16c   : > { %v2064_v59 = vpop.eup %2063  ;;  %v615_v60 = vpop.f32.mrf.mxu0 }
 0x16d   : > { %2077 = vtanh.f32 %v621_v58  ;;  %922 = vadd.xlane.f32.xlu1 %v873_v51  ;;  %v616_v0 = vadd.f32 %v2516_v53, %v615_v60  ;;  %v874_v2 = vmul.f32 %v2064_v59, %v815_v46  ;;  %v989_v51 = vand.u32 127, %v682_v50 }
 0x16e   : > { %v2066_v3 = vpop.eup %2065  ;;  %v1912_v5 = vpop.f32.mrf.mxu0 }
 0x16f   : > { %2079 = vtanh.f32 %v616_v0  ;;  %v631_v6 = vadd.f32 %v1912_v5, %v2516_v53  ;;  %924 = vadd.xlane.f32.xlu0 %v874_v2  ;;  %v877_v13 = vmul.f32 %v2066_v3, %v819_v61  ;;  %v994_v57 = vadd.s32 4294967288, %v989_v51 }
 0x170   : > { %v2068_v7 = vpop.eup %2067  ;;  %v625_v8 = vpop.f32.mrf.mxu0  ;;  %v2600_v60 = vsub.s32 %v989_v51, %v2511_v52 }
 0x171   : > { %2081 = vtanh.f32 %v631_v6  ;;  %926 = vadd.xlane.f32.xlu1 %v875_v1  ;;  %v626_v12 = vadd.f32 %v2516_v53, %v625_v8  ;;  %v876_v14 = vmul.f32 %v2068_v7, %v819_v61  ;;  %v2603_v61 = vsub.s32 %v994_v57, %v2511_v52 }
 0x172   : > { %v2070_v15 = vpop.eup %2069  ;;  %v1915_v16 = vpop.f32.mrf.mxu0 }
 0x173   : > { %2083 = vtanh.f32 %v626_v12  ;;  %v641_v17 = vadd.f32 %v1915_v16, %v2516_v53  ;;  %928 = vadd.xlane.f32.xlu0 %v876_v14  ;;  %v879_v23 = vmul.f32 %v2070_v15, %v823_v9 }
 0x174   : > { %v2072_v18 = vpop.eup %2071  ;;  %v635_v19 = vpop.f32.mrf.mxu0 }
 0x175   : > { %2085 = vtanh.f32 %v641_v17  ;;  %930 = vadd.xlane.f32.xlu1 %v877_v13  ;;  %v636_v22 = vadd.f32 %v2516_v53, %v635_v19  ;;  %v878_v24 = vmul.f32 %v2072_v18, %v823_v9  ;;  %v835_v53 = vrot.slane %v773_v30, %v2537_v4 }
 0x176   : > { %v2074_v25 = vpop.eup %2073 }
 0x177   : > { %2087 = vtanh.f32 %v636_v22  ;;  %932 = vadd.xlane.f32.xlu0 %v878_v24  ;;  %v881_v27 = vmul.f32 %v2074_v25, %v827_v20  ;;  %v952_v25 = vld [vmem:[%s2623_s26] sm:$0xff] }
 0x178   : > { %v2076_v26 = vpop.eup %2075  ;;  %vm954_vm8 = vcmp.ne.f32.partialorder %v952_v25, 0.0 }
 0x179   : > { %934 = vadd.xlane.f32.xlu1 %v879_v23  ;;  %v880_v28 = vmul.f32 %v2076_v26, %v827_v20 }
 0x17a   : > { %v2078_v31 = vpop.eup %2077 }
 0x17b   : > { %936 = vadd.xlane.f32.xlu0 %v880_v28  ;;  %v883_v55 = vmul.f32 %v2078_v31, %v831_v29 }
 0x17c   : > { %v2080_v32 = vpop.eup %2079 }
 0x17d   : > { %938 = vadd.xlane.f32.xlu1 %v881_v27  ;;  %v882_v33 = vmul.f32 %v2080_v32, %v831_v29 }
 0x17e   : > { %v2082_v35 = vpop.eup %2081 }
 0x17f   : > { %940 = vadd.xlane.f32.xlu0 %v882_v33  ;;  %v885_v37 = vmul.f32 %v2082_v35, %v835_v53 }
 0x180   : > { %v2084_v36 = vpop.eup %2083 }
 0x181   : > { %942 = vadd.xlane.f32.xlu1 %v883_v55  ;;  %v884_v38 = vmul.f32 %v2084_v36, %v835_v53 }
 0x182   : > { %v2086_v40 = vpop.eup %2085 }
 0x183   : > { %944 = vadd.xlane.f32.xlu0 %v884_v38  ;;  %v887_v42 = vmul.f32 %v2086_v40, %v839_v39 }
 0x184   : > { %v2088_v41 = vpop.eup %2087 }
 0x185   : > { %946 = vadd.xlane.f32.xlu1 %v885_v37  ;;  %v886_v43 = vmul.f32 %v2088_v41, %v839_v39 }
 0x187   : > { %948 = vadd.xlane.f32.xlu0 %v886_v43 }
 0x189   : > { %950 = vadd.xlane.f32.xlu1 %v887_v42 }
 0x1d2   : > { %v891_v44 = vpop.xlane.xlu0 %890 }
 0x1d3   : > { %v998_v8 = vrot.slane %v891_v44, %v2603_v61 }
 0x1d6   : > { %v895_v45 = vpop.xlane.xlu1 %894  ;;  %v889_v46 = vpop.xlane.xlu0 %888 }
 0x1d7   : > { %v1008_v2 = vrot.slane %v895_v45, %v2603_v61  ;;  %v993_v50 = vrot.slane %v889_v46, %v2600_v60 }
 0x1d9   : > { %v1000_v15 = vsel %vm999_vm0, %v998_v8, %v993_v50 }
 0x1da   : > { %v893_v47 = vpop.xlane.xlu1 %892 }
 0x1db   : > { %v1004_v63 = vrot.slane %v893_v47, %v2600_v60 }
 0x1dc   : > { %v897_v48 = vpop.xlane.xlu0 %896 }
 0x1dd   : > { %v1013_v5 = vrot.slane %v897_v48, %v2600_v60  ;;  %v1009_v9 = vsel %vm999_vm0, %v1008_v2, %v1004_v63 }
 0x1de   : > { %v899_v49 = vpop.xlane.xlu1 %898  ;;  %v1137_v19 = vsel %vm1136_vm1, %v1009_v9, %v1000_v15 }
 0x1df   : > { %v1017_v0 = vrot.slane %v899_v49, %v2603_v61 }
 0x1e0   : > { %v901_v54 = vpop.xlane.xlu0 %900 }
 0x1e1   : > { %v1022_v10 = vrot.slane %v901_v54, %v2600_v60  ;;  %v1018_v12 = vsel %vm999_vm0, %v1017_v0, %v1013_v5 }
 0x1e2   : > { %v903_v56 = vpop.xlane.xlu1 %902  ;;  %v1139_v23 = vsel %vm1138_vm2, %v1018_v12, %v1137_v19 }
 0x1e3   : > { %v1026_v3 = vrot.slane %v903_v56, %v2603_v61 }
 0x1e4   : > { %v905_v58 = vpop.xlane.xlu0 %904 }
 0x1e5   : > { %v1031_v13 = vrot.slane %v905_v58, %v2600_v60  ;;  %v1027_v16 = vsel %vm999_vm0, %v1026_v3, %v1022_v10 }
 0x1e6   : > { %v907_v59 = vpop.xlane.xlu1 %906  ;;  %v1141_v26 = vsel %vm1140_vm3, %v1027_v16, %v1139_v23 }
 0x1e7   : > { %v1035_v6 = vrot.slane %v907_v59, %v2603_v61 }
 0x1e8   : > { %v909_v62 = vpop.xlane.xlu0 %908 }
 0x1e9   : > { %v1040_v17 = vrot.slane %v909_v62, %v2600_v60  ;;  %v1036_v20 = vsel %vm999_vm0, %v1035_v6, %v1031_v13 }
 0x1ea   : > { %v911_v1 = vpop.xlane.xlu1 %910  ;;  %v1143_v29 = vsel %vm1142_vm4, %v1036_v20, %v1141_v26 }
 0x1eb   : > { %v1044_v11 = vrot.slane %v911_v1, %v2603_v61 }
 0x1ec   : > { %v913_v7 = vpop.xlane.xlu0 %912 }
 0x1ed   : > { %v1049_v21 = vrot.slane %v913_v7, %v2600_v60  ;;  %v1045_v24 = vsel %vm999_vm0, %v1044_v11, %v1040_v17  ;;  %v953_v17 = vld [vmem:[%s2623_s26 + $0x8] sm:$0xff] }
 0x1ee   : > { %v915_v14 = vpop.xlane.xlu1 %914  ;;  %v1145_v32 = vsel %vm1144_vm5, %v1045_v24, %v1143_v29  ;;  %vm955_vm10 = vcmp.ne.f32.partialorder %v953_v17, 0.0 }
 0x1ef   : > { %v1053_v18 = vrot.slane %v915_v14, %v2603_v61 }
 0x1f0   : > { %v917_v22 = vpop.xlane.xlu0 %916 }
 0x1f1   : > { %v1054_v27 = vsel %vm999_vm0, %v1053_v18, %v1049_v21  ;;  %v1058_v30 = vrot.slane %v917_v22, %v2600_v60 }
 0x1f2   : > { %v919_v28 = vpop.xlane.xlu1 %918  ;;  %v1147_v33 = vsel %vm1146_vm6, %v1054_v27, %v1145_v32 }
 0x1f3   : > { %v1062_v31 = vrot.slane %v919_v28, %v2603_v61 }
 0x1f4   : > { %v921_v55 = vpop.xlane.xlu0 %920 }
 0x1f5   : > { %v1063_v53 = vsel %vm999_vm0, %v1062_v31, %v1058_v30  ;;  %v1067_v59 = vrot.slane %v921_v55, %v2600_v60 }
 0x1f6   : > { %v1149_v34 = vsel %vm1148_vm7, %v1063_v53, %v1147_v33  ;;  %v923_v35 = vpop.xlane.xlu1 %922  ;;  %v1191_v53 = vsub.s32 1, %v2511_v52 }
 0x1f7   : > { %v1159_v36 = vsel %vm954_vm8, 0.0, %v1149_v34  ;;  %v1071_v58 = vrot.slane %v923_v35, %v2603_v61  ;;  %v1202_v34 = vsub.s32 2, %v2511_v52 }
 0x1f8   : > { %v1161_v37 = vmul.f32 1.442695, %v1159_v36  ;;  %v925_v38 = vpop.xlane.xlu0 %924 }
 0x1f9   : > { %v1076_v51 = vrot.slane %v925_v38, %v2600_v60  ;;  %v1072_v9 = vsel %vm999_vm0, %v1071_v58, %v1067_v59  ;;  %v393_v59 = vld [vmem:[#allocation7 + $0x68] sm:$0xff] }
 0x1fa   : > { %2089 = vpow2.f32 %v1161_v37  ;;  %v927_v39 = vpop.xlane.xlu1 %926  ;;  %v1213_v37 = vsub.s32 3, %v2511_v52 }
 0x1fb   : > { %v1080_v49 = vrot.slane %v927_v39, %v2603_v61  ;;  %v1224_v39 = vsub.s32 4, %v2511_v52 }
 0x1fc   : > { %v929_v40 = vpop.xlane.xlu0 %928 }
 0x1fd   : > { %v1085_v56 = vrot.slane %v929_v40, %v2600_v60  ;;  %v1081_v50 = vsel %vm999_vm0, %v1080_v49, %v1076_v51 }
 0x1fe   : > { %v931_v41 = vpop.xlane.xlu1 %930  ;;  %v1150_v12 = vsel %vm1136_vm1, %v1081_v50, %v1072_v9  ;;  %v389_v50 = vld [vmem:[#allocation7 + $0x48] sm:$0xff] }
 0x1ff   : > { %v1089_v54 = vrot.slane %v931_v41, %v2603_v61  ;;  %v1235_v41 = vsub.s32 5, %v2511_v52  ;;  %v385_v9 = vld [vmem:[#allocation7 + $0x28] sm:$0xff] }
 0x200   : > { %v933_v42 = vpop.xlane.xlu0 %932 }
 0x201   : > { %v1094_v63 = vrot.slane %v933_v42, %v2600_v60  ;;  %v1090_v6 = vsel %vm999_vm0, %v1089_v54, %v1085_v56 }
 0x202   : > { %v935_v43 = vpop.xlane.xlu1 %934  ;;  %v1151_v15 = vsel %vm1138_vm2, %v1090_v6, %v1150_v12  ;;  %v387_v6 = vld [vmem:[#allocation7 + $0x38] sm:$0xff]  ;;  %v382_v12 = vld [vmem:[#allocation7 + $0x10] sm:$0xff] }
 0x203   : > { %v1098_v62 = vrot.slane %v935_v43, %v2603_v61 }
 0x204   : > { %v937_v44 = vpop.xlane.xlu0 %936 }
 0x205   : > { %v1103_v1 = vrot.slane %v937_v44, %v2600_v60  ;;  %v1099_v10 = vsel %vm999_vm0, %v1098_v62, %v1094_v63  ;;  %v392_v63 = vld [vmem:[#allocation7 + $0x60] sm:$0xff] }
 0x206   : > { %v939_v45 = vpop.xlane.xlu1 %938  ;;  %v1152_v19 = vsel %vm1140_vm3, %v1099_v10, %v1151_v15  ;;  %v384_v10 = vld [vmem:[#allocation7 + $0x20] sm:$0xff] }
 0x207   : > { %v2090_v46 = vpop.eup %2089  ;;  %v1107_v0 = vrot.slane %v939_v45, %v2603_v61  ;;  %v1246_v45 = vsub.s32 6, %v2511_v52 }
 0x208   : > { %v1166_v47 = vsel %vm1165_vm9, %v2090_v46, 0.0  ;;  %v941_v48 = vpop.xlane.xlu0 %940 }
 0x209   : > { %1167 = vadd.xlane.f32.xlu0 %v1166_v47  ;;  %v1112_v5 = vrot.slane %v941_v48, %v2600_v60  ;;  %v1108_v13 = vsel %vm999_vm0, %v1107_v0, %v1103_v1  ;;  %v1257_v47 = vsub.s32 7, %v2511_v52  ;;  %v394_v52 = vld [vmem:[#allocation7 + $0x70] sm:$0xff] }
 0x20a   : > { %v943_v57 = vpop.xlane.xlu1 %942  ;;  %v1153_v22 = vsel %vm1142_vm4, %v1108_v13, %v1152_v19  ;;  %v390_v1 = vld [vmem:[#allocation7 + $0x50] sm:$0xff]  ;;  %v381_v13 = vld [vmem:[#allocation7 + $0x8] sm:$0xff] }
 0x20b   : > { %v1116_v3 = vrot.slane %v943_v57, %v2603_v61  ;;  %v395_v57 = vld [vmem:[#allocation7 + $0x78] sm:$0xff] }
 0x20c   : > { %v945_v2 = vpop.xlane.xlu0 %944  ;;  %1916 = vmatprep.subr.mxu1 %v395_v57 }
 0x20d   : > { %v1121_v8 = vrot.slane %v945_v2, %v2600_v60  ;;  %v1117_v16 = vsel %vm999_vm0, %v1116_v3, %v1112_v5  ;;  %1917 = vmatpush3.msra.mxu1 %v395_v57  ;;  %v388_v3 = vld [vmem:[#allocation7 + $0x40] sm:$0xff] }
 0x20e   : > { %v947_v7 = vpop.xlane.xlu1 %946  ;;  %v1154_v24 = vsel %vm1144_vm5, %v1117_v16, %v1153_v22  ;;  %1918 = vmatprep.subr.mxu1 %v394_v52 }
 0x20f   : > { %v1125_v11 = vrot.slane %v947_v7, %v2603_v61  ;;  %1919 = vmatpush3.msra.mxu1 %v394_v52 }
 0x210   : > { %v949_v14 = vpop.xlane.xlu0 %948  ;;  %1920 = vmatprep.subr.mxu1 %v393_v59 }
 0x211   : > { %v1130_v18 = vrot.slane %v949_v14, %v2600_v60  ;;  %v1126_v20 = vsel %vm999_vm0, %v1125_v11, %v1121_v8  ;;  %1921 = vmatpush3.msra.mxu1 %v393_v59  ;;  %v386_v8 = vld [vmem:[#allocation7 + $0x30] sm:$0xff]  ;;  %v383_v11 = vld [vmem:[#allocation7 + $0x18] sm:$0xff]  ;;  %v380_v14 = vld [vmem:[#allocation7] sm:$0xff] }
 0x212   : > { %v951_v21 = vpop.xlane.xlu1 %950  ;;  %v1155_v25 = vsel %vm1146_vm6, %v1126_v20, %v1154_v24  ;;  %1922 = vmatprep.subr.mxu1 %v392_v63 }
 0x213   : > { %v1134_v23 = vrot.slane %v951_v21, %v2603_v61  ;;  %1923 = vmatpush3.msra.mxu1 %v392_v63  ;;  %v2097_v21 = vld [vmem:[%s2464_s14 + $0x18] sm:$0xff]  ;;  %v2107_v63 = vld [vmem:[%s2464_s14 + $0x50] sm:$0xff] }
 0x215   : > { %v1135_v26 = vsel %vm999_vm0, %v1134_v23, %v1130_v18 }
 0x216   : > { %v1156_v27 = vsel %vm1148_vm7, %v1135_v26, %v1155_v25  ;;  %v2098_v25 = vld [vmem:[%s2464_s14 + $0x28] sm:$0xff] }
 0x217   : > { %v1160_v28 = vsel %vm955_vm10, 0.0, %v1156_v27  ;;  %v2099_v27 = vld [vmem:[%s2464_s14 + $0x8] sm:$0xff] }
 0x218   : > { %v1163_v60 = vmul.f32 1.442695, %v1160_v28 }
 0x21a   : > { %2091 = vpow2.f32 %v1163_v60  ;;  %v2100_v60 = vld [vmem:[%s2464_s14] sm:$0xff] }
 0x227   : > { %v2092_v29 = vpop.eup %2091 }
 0x228   : > { %v1169_v30 = vsel %vm1165_vm9, %v2092_v29, 0.0 }
 0x229   : > { %1170 = vadd.xlane.f32.xlu1 %v1169_v30  ;;  %v2101_v30 = vld [vmem:[%s2464_s14 + $0x10] sm:$0xff] }
 0x292   : > { %v1168_v31 = vpop.xlane.xlu0 %1167 }
 0x293   : > { %v1172_v32 = vadd.f32 1e-12, %v1168_v31 }
 0x295   : > { %2093 = vrcp.f32 %v1172_v32  ;;  %v2102_v32 = vld [vmem:[%s2464_s14 + $0x20] sm:$0xff] }
 0x2a2   : > { %v2094_v61 = vpop.eup %2093 }
 0x2a3   : > { %v1176_v55 = vmul.f32 %v2094_v61, %v2090_v46 }
 0x2a5   : > { %v1181_v33 = vrot.slane %v1176_v55, %v2537_v4  ;;  %v1192_v35 = vrot.slane %v1176_v55, %v1191_v53  ;;  %v1203_v36 = vrot.slane %v1176_v55, %v1202_v34  ;;  %v1214_v38 = vrot.slane %v1176_v55, %v1213_v37 }
 0x2a6   : > { %v1225_v40 = vrot.slane %v1176_v55, %v1224_v39  ;;  %v1236_v44 = vrot.slane %v1176_v55, %v1235_v41  ;;  %v1247_v46 = vrot.slane %v1176_v55, %v1246_v45  ;;  %v1258_v48 = vrot.slane %v1176_v55, %v1257_v47 }
 0x2a7   : > { %1187 = vbcast.lane.b32.xlu1 %v1181_v33, 264  ;;  %1183 = vbcast.lane.b32.xlu0 %v1181_v33, 256 }
 0x2ab   : > { %1194 = vbcast.lane.b32.xlu1 %v1192_v35, 256  ;;  %1205 = vbcast.lane.b32.xlu0 %v1203_v36, 256 }
 0x2af   : > { %1198 = vbcast.lane.b32.xlu1 %v1192_v35, 264  ;;  %1216 = vbcast.lane.b32.xlu0 %v1214_v38, 256 }
 0x2b2   : > { %v1171_v42 = vpop.xlane.xlu1 %1170 }
 0x2b3   : > { %v1173_v43 = vadd.f32 1e-12, %v1171_v42  ;;  %1209 = vbcast.lane.b32.xlu1 %v1203_v36, 264  ;;  %1227 = vbcast.lane.b32.xlu0 %v1225_v40, 256 }
 0x2b5   : > { %2095 = vrcp.f32 %v1173_v43 }
 0x2b7   : > { %1220 = vbcast.lane.b32.xlu1 %v1214_v38, 264  ;;  %1238 = vbcast.lane.b32.xlu0 %v1236_v44, 256 }
 0x2bb   : > { %1231 = vbcast.lane.b32.xlu1 %v1225_v40, 264  ;;  %1249 = vbcast.lane.b32.xlu0 %v1247_v46, 256 }
 0x2bf   : > { %1242 = vbcast.lane.b32.xlu1 %v1236_v44, 264  ;;  %1260 = vbcast.lane.b32.xlu0 %v1258_v48, 256  ;;  %v2105_v44 = vld [vmem:[%s2464_s14 + $0x40] sm:$0xff] }
 0x2c2   : > { %v2096_v49 = vpop.eup %2095 }
 0x2c3   : > { %v1177_v51 = vmul.f32 %v2096_v49, %v2092_v29  ;;  %1253 = vbcast.lane.b32.xlu1 %v1247_v46, 264  ;;  %v2106_v46 = vld [vmem:[%s2464_s14 + $0x48] sm:$0xff] }
 0x2c5   : > { %v1269_v54 = vrot.slane %v1177_v51, %v2537_v4  ;;  %v1280_v56 = vrot.slane %v1177_v51, %v1191_v53  ;;  %v1291_v58 = vrot.slane %v1177_v51, %v1202_v34  ;;  %v1302_v62 = vrot.slane %v1177_v51, %v1213_v37  ;;  %v391_v4 = vld [vmem:[#allocation7 + $0x58] sm:$0xff]  ;;  %v2103_v34 = vld [vmem:[%s2464_s14 + $0x30] sm:$0xff] }
 0x2c6   : > { %v1313_v0 = vrot.slane %v1177_v51, %v1224_v39  ;;  %1924 = vmatprep.subr.mxu1 %v391_v4  ;;  %v1324_v2 = vrot.slane %v1177_v51, %v1235_v41  ;;  %v1335_v5 = vrot.slane %v1177_v51, %v1246_v45  ;;  %v1346_v7 = vrot.slane %v1177_v51, %v1257_v47  ;;  %v2104_v37 = vld [vmem:[%s2464_s14 + $0x38] sm:$0xff] }
 0x2c7   : > { %1264 = vbcast.lane.b32.xlu1 %v1258_v48, 264  ;;  %1271 = vbcast.lane.b32.xlu0 %v1269_v54, 256 }
 0x2c8   : > { %1925 = vmatpush3.msra.mxu1 %v391_v4 }
 0x2c9   : > { %1926 = vmatprep.subr.mxu1 %v390_v1 }
 0x2ca   : > { %1927 = vmatpush3.msra.mxu1 %v390_v1 }
 0x2cb   : > { %1275 = vbcast.lane.b32.xlu1 %v1269_v54, 264  ;;  %1282 = vbcast.lane.b32.xlu0 %v1280_v56, 256 }
 0x2cc   : > { %1928 = vmatprep.subr.mxu1 %v389_v50 }
 0x2cd   : > { %1929 = vmatpush3.msra.mxu1 %v389_v50 }
 0x2ce   : > { %1930 = vmatprep.subr.mxu1 %v388_v3 }
 0x2cf   : > { %1286 = vbcast.lane.b32.xlu1 %v1280_v56, 264  ;;  %1293 = vbcast.lane.b32.xlu0 %v1291_v58, 256 }
 0x2d0   : > { %1931 = vmatpush3.msra.mxu1 %v388_v3 }
 0x2d1   : > { %1932 = vmatprep.subr.mxu1 %v387_v6 }
 0x2d2   : > { %1933 = vmatpush3.msra.mxu1 %v387_v6 }
 0x2d3   : > { %1297 = vbcast.lane.b32.xlu1 %v1291_v58, 264  ;;  %1304 = vbcast.lane.b32.xlu0 %v1302_v62, 256 }
 0x2d4   : > { %1934 = vmatprep.subr.mxu1 %v386_v8 }
 0x2d5   : > { %1935 = vmatpush3.msra.mxu1 %v386_v8  ;;  %v2109_v8 = vld [vmem:[%s2464_s14 + $0x60] sm:$0xff] }
 0x2d6   : > { %1936 = vmatprep.subr.mxu1 %v385_v9 }
 0x2d7   : > { %1308 = vbcast.lane.b32.xlu1 %v1302_v62, 264  ;;  %1315 = vbcast.lane.b32.xlu0 %v1313_v0, 256 }
 0x2d8   : > { %1937 = vmatpush3.msra.mxu1 %v385_v9 }
 0x2d9   : > { %1938 = vmatprep.subr.mxu1 %v384_v10 }
 0x2da   : > { %1939 = vmatpush3.msra.mxu1 %v384_v10  ;;  %v2110_v10 = vld [vmem:[%s2464_s14 + $0x68] sm:$0xff] }
 0x2db   : > { %1319 = vbcast.lane.b32.xlu1 %v1313_v0, 264  ;;  %1326 = vbcast.lane.b32.xlu0 %v1324_v2, 256  ;;  %v2108_v0 = vld [vmem:[%s2464_s14 + $0x58] sm:$0xff] }
 0x2dc   : > { %1940 = vmatprep.subr.mxu1 %v383_v11 }
 0x2dd   : > { %1941 = vmatpush3.msra.mxu1 %v383_v11 }
 0x2de   : > { %1942 = vmatprep.subr.mxu1 %v382_v12 }
 0x2df   : > { %1330 = vbcast.lane.b32.xlu1 %v1324_v2, 264  ;;  %1337 = vbcast.lane.b32.xlu0 %v1335_v5, 256 }
 0x2e0   : > { %1943 = vmatpush3.msra.mxu1 %v382_v12 }
 0x2e1   : > { %1944 = vmatprep.subr.mxu1 %v381_v13 }
 0x2e2   : > { %1945 = vmatpush3.msra.mxu1 %v381_v13 }
 0x2e3   : > { %1341 = vbcast.lane.b32.xlu1 %v1335_v5, 264  ;;  %1348 = vbcast.lane.b32.xlu0 %v1346_v7, 256 }
 0x2e4   : > { %1946 = vmatprep.subr.mxu1 %v380_v14 }
 0x2e5   : > { %1947 = vmatpush3.msra.mxu1 %v380_v14 }
 0x2e7   : > { %1352 = vbcast.lane.b32.xlu1 %v1346_v7, 264 }
 0x319   : > { %v1188_v15 = vpop.permute.xlu1 %1187  ;;  %v1184_v16 = vpop.permute.xlu0 %1183 }
 0x31a   : > { %v1355_v28 = vmul.f32 %v2099_v27, %v1188_v15  ;;  %v1354_v29 = vmul.f32 %v2100_v60, %v1184_v16 }
 0x31c   : > { %v1386_v39 = vadd.f32 %v1355_v28, %v1354_v29 }
 0x31d   : > { %v1195_v17 = vpop.permute.xlu1 %1194  ;;  %v1206_v18 = vpop.permute.xlu0 %1205 }
 0x31e   : > { %v1356_v31 = vmul.f32 %v2101_v30, %v1195_v17  ;;  %v1358_v61 = vmul.f32 %v2102_v32, %v1206_v18  ;;  %v1387_v48 = vrot.slane %v1386_v39, 4 }
 0x320   : > { %v1388_v59 = vadd.f32 %v1387_v48, %v1386_v39 }
 0x321   : > { %v1199_v19 = vpop.permute.xlu1 %1198  ;;  %v1217_v20 = vpop.permute.xlu0 %1216 }
 0x322   : > { %v1357_v22 = vmul.f32 %v2097_v21, %v1199_v19  ;;  %v1360_v35 = vmul.f32 %v2103_v34, %v1217_v20  ;;  %v1389_v12 = vrot.slane %v1388_v59, 2 }
 0x324   : > { %v1393_v55 = vadd.f32 %v1357_v22, %v1356_v31  ;;  %v2111_v22 = vld [vmem:[%s2464_s14 + $0x70] sm:$0xff]  ;;  %v1390_v27 = vadd.f32 %v1389_v12, %v1388_v59  ;;  %v2114_v59 = vld [vmem:[%s2464_s14 + $0x88] sm:$0xff] }
 0x325   : > { %v1210_v23 = vpop.permute.xlu1 %1209  ;;  %v1228_v24 = vpop.permute.xlu0 %1227 }
 0x326   : > { %v1359_v26 = vmul.f32 %v2098_v25, %v1210_v23  ;;  %v1394_v41 = vrot.slane %v1393_v55, 4  ;;  %v1362_v45 = vmul.f32 %v2105_v44, %v1228_v24  ;;  %v2112_v25 = vld [vmem:[%s2464_s14 + $0x78] sm:$0xff] }
 0x328   : > { %v1400_v36 = vadd.f32 %v1359_v26, %v1358_v61  ;;  %v1395_v56 = vadd.f32 %v1394_v41, %v1393_v55 }
 0x329   : > { %v1221_v33 = vpop.permute.xlu1 %1220  ;;  %v1239_v53 = vpop.permute.xlu0 %1238 }
 0x32a   : > { %v1361_v38 = vmul.f32 %v2104_v37, %v1221_v33  ;;  %v1401_v43 = vrot.slane %v1400_v36, 4  ;;  %v1364_v4 = vmul.f32 %v2107_v63, %v1239_v53  ;;  %v1396_v50 = vrot.slane %v1395_v56, 2 }
 0x32c   : > { %v1407_v40 = vadd.f32 %v1361_v38, %v1360_v35  ;;  %v1402_v58 = vadd.f32 %v1401_v43, %v1400_v36  ;;  %v1397_v17 = vadd.f32 %v1396_v50, %v1395_v56  ;;  %v1391_v36 = vrot.slane %v1390_v27, 1 }
 0x32d   : > { %v1232_v42 = vpop.permute.xlu1 %1231  ;;  %v1250_v51 = vpop.permute.xlu0 %1249 }
 0x32e   : > { %v1363_v47 = vmul.f32 %v2106_v46, %v1232_v42  ;;  %v1408_v49 = vrot.slane %v1407_v40, 4  ;;  %v1403_v7 = vrot.slane %v1402_v58, 2  ;;  %v1366_v9 = vmul.f32 %v2109_v8, %v1250_v51  ;;  %v2118_v8 = vld [vmem:[%s2464_s14 + $0xa0] sm:$0xff] }
 0x32f   : > { %v1398_v32 = vrot.slane %v1397_v17, 1 }
 0x330   : > { %v1414_v54 = vadd.f32 %v1363_v47, %v1362_v45  ;;  %v1409_v62 = vadd.f32 %v1408_v49, %v1407_v40  ;;  %v1404_v21 = vadd.f32 %v1403_v7, %v1402_v58  ;;  %v1392_v47 = vadd.f32 %v1391_v36, %v1390_v27 }
 0x331   : > { %v1243_v57 = vpop.permute.xlu1 %1242  ;;  %v1261_v5 = vpop.permute.xlu0 %1260  ;;  %v1399_v41 = vadd.f32 %v1398_v32, %v1397_v17  ;;  %v2121_v32 = vld [vmem:[%s2464_s14 + $0xc0] sm:$0xff] }
 0x332   : > { %v1415_v52 = vrot.slane %v1414_v54, 4  ;;  %v1365_v1 = vmul.f32 %v2108_v0, %v1243_v57  ;;  %v1410_v13 = vrot.slane %v1409_v62, 2  ;;  %v1368_v23 = vmul.f32 %v2111_v22, %v1261_v5  ;;  %v2115_v0 = vld [vmem:[%s2464_s14 + $0x90] sm:$0xff] }
 0x333   : > { %v1405_v53 = vrot.slane %v1404_v21, 1  ;;  %v1514_v58 = vsel %vm1136_vm1, %v1399_v41, %v1392_v47  ;;  %v2123_v41 = vld [vmem:[%s2464_s14 + $0xd0] sm:$0xff] }
 0x334   : > { %v1416_v2 = vadd.f32 %v1415_v52, %v1414_v54  ;;  %v1421_v3 = vadd.f32 %v1365_v1, %v1364_v4  ;;  %v1411_v28 = vadd.f32 %v1410_v13, %v1409_v62  ;;  %v2113_v54 = vld [vmem:[%s2464_s14 + $0x98] sm:$0xff] }
 0x335   : > { %v1254_v6 = vpop.permute.xlu1 %1253  ;;  %v1406_v45 = vadd.f32 %v1405_v53, %v1404_v21  ;;  %v2119_v21 = vld [vmem:[%s2464_s14 + $0xb0] sm:$0xff] }
 0x336   : > { %v1367_v11 = vmul.f32 %v2110_v10, %v1254_v6  ;;  %v1422_v14 = vrot.slane %v1421_v3, 4  ;;  %v1417_v15 = vrot.slane %v1416_v2, 2  ;;  %v1412_v37 = vrot.slane %v1411_v28, 1  ;;  %v2117_v6 = vld [vmem:[%s2464_s14 + $0x80] sm:$0xff] }
 0x337   : > { %v1515_v5 = vsel %vm1138_vm2, %v1406_v45, %v1514_v58  ;;  %v2126_v58 = vld [vmem:[%s2464_s14 + $0xe8] sm:$0xff] }
 0x338   : > { %v1428_v16 = vadd.f32 %v1367_v11, %v1366_v9  ;;  %v1423_v18 = vadd.f32 %v1422_v14, %v1421_v3  ;;  %v1418_v29 = vadd.f32 %v1417_v15, %v1416_v2  ;;  %v1413_v48 = vadd.f32 %v1412_v37, %v1411_v28  ;;  %v2116_v2 = vld [vmem:[%s2464_s14 + $0xa8] sm:$0xff] }
 0x339   : > { %v1265_v19 = vpop.permute.xlu1 %1264  ;;  %v1272_v20 = vpop.permute.xlu0 %1271 }
 0x33a   : > { %v1429_v24 = vrot.slane %v1428_v16, 4  ;;  %v1369_v26 = vmul.f32 %v2112_v25, %v1265_v19  ;;  %v1424_v60 = vrot.slane %v1423_v18, 2  ;;  %v1419_v38 = vrot.slane %v1418_v29, 1 }
 0x33b   : > { %v1370_v7 = vmul.f32 %v2117_v6, %v1272_v20  ;;  %v1516_v11 = vsel %vm1140_vm3, %v1413_v48, %v1515_v5  ;;  %v2120_v20 = vld [vmem:[%s2464_s14 + $0xb8] sm:$0xff] }
 0x33c   : > { %v1430_v30 = vadd.f32 %v1429_v24, %v1428_v16  ;;  %v1435_v31 = vadd.f32 %v1369_v26, %v1368_v23  ;;  %v1425_v61 = vadd.f32 %v1424_v60, %v1423_v18  ;;  %v1420_v51 = vadd.f32 %v1419_v38, %v1418_v29 }
 0x33d   : > { %v1276_v55 = vpop.permute.xlu1 %1275  ;;  %v1283_v33 = vpop.permute.xlu0 %1282 }
 0x33e   : > { %v1431_v34 = vrot.slane %v1430_v30, 2  ;;  %v1436_v35 = vrot.slane %v1435_v31, 4  ;;  %v1426_v42 = vrot.slane %v1425_v61, 1  ;;  %v1371_v62 = vmul.f32 %v2114_v59, %v1276_v55  ;;  %v2122_v55 = vld [vmem:[%s2464_s14 + $0xc8] sm:$0xff] }
 0x33f   : > { %v1372_v1 = vmul.f32 %v2115_v0, %v1283_v33  ;;  %v1517_v13 = vsel %vm1142_vm4, %v1420_v51, %v1516_v11 }
 0x340   : > { %v1432_v39 = vadd.f32 %v1431_v34, %v1430_v30  ;;  %v1437_v40 = vadd.f32 %v1436_v35, %v1435_v31  ;;  %v1427_v52 = vadd.f32 %v1426_v42, %v1425_v61  ;;  %v1442_v14 = vadd.f32 %v1371_v62, %v1370_v7  ;;  %v2127_v7 = vld [vmem:[%s2464_s14 + $0xf0] sm:$0xff] }
 0x341   : > { %v1287_v43 = vpop.permute.xlu1 %1286  ;;  %v1294_v44 = vpop.permute.xlu0 %1293 }
 0x342   : > { %v1438_v46 = vrot.slane %v1437_v40, 2  ;;  %v1433_v49 = vrot.slane %v1432_v39, 1  ;;  %v1373_v56 = vmul.f32 %v2113_v54, %v1287_v43  ;;  %v1374_v9 = vmul.f32 %v2118_v8, %v1294_v44  ;;  %v2124_v43 = vld [vmem:[%s2464_s14 + $0xd8] sm:$0xff] }
 0x343   : > { %v1518_v19 = vsel %vm1144_vm5, %v1427_v52, %v1517_v13  ;;  %v1443_v28 = vrot.slane %v1442_v14, 4 }
 0x344   : > { %v1439_v57 = vadd.f32 %v1438_v46, %v1437_v40  ;;  %v1434_v3 = vadd.f32 %v1433_v49, %v1432_v39  ;;  %v1449_v12 = vadd.f32 %v1373_v56, %v1372_v1  ;;  %v2125_v56 = vld [vmem:[%s2464_s14 + $0xe0] sm:$0xff] }
 0x345   : > { %v1298_v63 = vpop.permute.xlu1 %1297  ;;  %v1305_v4 = vpop.permute.xlu0 %1304  ;;  %v1444_v35 = vadd.f32 %v1443_v28, %v1442_v14 }
 0x346   : > { %v1375_v50 = vmul.f32 %v2116_v2, %v1298_v63  ;;  %v1440_v10 = vrot.slane %v1439_v57, 1  ;;  %v1376_v22 = vmul.f32 %v2119_v21, %v1305_v4  ;;  %v1519_v24 = vsel %vm1146_vm6, %v1434_v3, %v1518_v19 }
 0x347   : > { %v1450_v26 = vrot.slane %v1449_v12, 4  ;;  %v1445_v47 = vrot.slane %v1444_v35, 2 }
 0x348   : > { %v1456_v15 = vadd.f32 %v1375_v50, %v1374_v9  ;;  %v1441_v18 = vadd.f32 %v1440_v10, %v1439_v57  ;;  %v2128_v9 = vld [vmem:[%s2464_s14 + $0xf8] sm:$0xff]  ;;  %s1769_s14 = sshll.u32 %s2346_s25, 8  ;;  %s2287_s25 = smov [#allocation8]  }
 0x349   : > { %v1309_v16 = vpop.permute.xlu1 %1308  ;;  %v1316_v17 = vpop.permute.xlu0 %1315  ;;  %v1451_v53 = vadd.f32 %v1450_v26, %v1449_v12  ;;  %v1446_v1 = vadd.f32 %v1445_v47, %v1444_v35  ;;  %s2742_s15 = scalar_lea.hbm %s2790_s6, %s1769_s14  ;;  %s2215_s20 = sshll.u32 %s2287_s25, 4  ;;  %s2216_s20 = int_to_ptr.vmem [resolvable:$false] %s2215_s20 }
 0x34a   : > { %v1377_v23 = vmul.f32 %v2120_v20, %v1309_v16  ;;  %v1520_v25 = vsel %vm1148_vm7, %v1441_v18, %v1519_v24  ;;  %v1457_v60 = vrot.slane %v1456_v15, 4  ;;  %v1378_v61 = vmul.f32 %v2121_v32, %v1316_v17  ;;  %p2218_p13 = scmp.lt.s32.totalorder %s2737_s9, %s2216_s20 }
 0x34b   : > { %1948 = vmatprep.mubr.f32.mxu1 %v1520_v25  ;;  %v1452_v45 = vrot.slane %v1451_v53, 2  ;;  %v1447_v18 = vrot.slane %v1446_v1, 1 }
 0x34c   : > { %v1463_v27 = vadd.f32 %v1377_v23, %v1376_v22  ;;  %v1458_v36 = vadd.f32 %v1457_v60, %v1456_v15 }
 0x34d   : > { %v1320_v29 = vpop.permute.xlu1 %1319  ;;  %v1327_v30 = vpop.permute.xlu0 %1326  ;;  %v1453_v4 = vadd.f32 %v1452_v45, %v1451_v53  ;;  %v1448_v28 = vadd.f32 %v1447_v18, %v1446_v1  ;;  %v2130_v45 = vld [vmem:[%s2523_s16] sm:$0xff] }
 0x34e   : > { %v1464_v31 = vrot.slane %v1463_v27, 4  ;;  %v1379_v33 = vmul.f32 %v2122_v55, %v1320_v29  ;;  %v1380_v42 = vmul.f32 %v2123_v41, %v1327_v30  ;;  %v1459_v48 = vrot.slane %v1458_v36, 2  ;;  %v2129_v41 = vld [vmem:[%s2523_s16 + $0x8] sm:$0xff]  ;;  %s2217_s16 = scalar_lea.vmem %s2216_s20, 512 }
 0x34f   : > { %v1454_v13 = vrot.slane %v1453_v4, 1  ;;  %p2219_p0 = scmp.lt.s32.totalorder %s2217_s16, %s2211_s18 }
 0x350   : > { %v1470_v34 = vadd.f32 %v1379_v33, %v1378_v61  ;;  %v1465_v39 = vadd.f32 %v1464_v31, %v1463_v27  ;;  %v1460_v2 = vadd.f32 %v1459_v48, %v1458_v36 }
 0x351   : > { %v1331_v37 = vpop.permute.xlu1 %1330  ;;  %v1338_v38 = vpop.permute.xlu0 %1337  ;;  %v1455_v23 = vadd.f32 %v1454_v13, %v1453_v4  ;;  %p2220_p5 = por %p2219_p0, %p2218_p13 }
 0x352   : > { %v1471_v40 = vrot.slane %v1470_v34, 4  ;;  %v1381_v44 = vmul.f32 %v2124_v43, %v1331_v37  ;;  %v1466_v54 = vrot.slane %v1465_v39, 2  ;;  %v1382_v57 = vmul.f32 %v2125_v56, %v1338_v38 }
 0x353   : > { %v1461_v16 = vrot.slane %v1460_v2, 1  ;;  %v1521_v32 = vsel %vm1136_vm1, %v1455_v23, %v1448_v28  ;;  %p2221_p10 = pnand %p2220_p5, %p2214_p12 }
 0x354   : > { %v1472_v46 = vadd.f32 %v1471_v40, %v1470_v34  ;;  %v1477_v49 = vadd.f32 %v1381_v44, %v1380_v42  ;;  %v1467_v5 = vadd.f32 %v1466_v54, %v1465_v39  ;;  %v1606_v42 = vmul.f32 0.5, %v2129_v41 }
 0x355   : > { %v1342_v51 = vpop.permute.xlu1 %1341  ;;  %v1349_v63 = vpop.permute.xlu0 %1348  ;;  %v1462_v27 = vadd.f32 %v1461_v16, %v1460_v2 }
 0x356   : > { %v1383_v52 = vmul.f32 %v2126_v58, %v1342_v51  ;;  %v1473_v59 = vrot.slane %v1472_v46, 2  ;;  %v1478_v62 = vrot.slane %v1477_v49, 4  ;;  %v1384_v8 = vmul.f32 %v2127_v7, %v1349_v63 }
 0x357   : > { %v1468_v19 = vrot.slane %v1467_v5, 1  ;;  %v1522_v53 = vsel %vm1138_vm2, %v1462_v27, %v1521_v32 }
 0x358   : > { %v1484_v0 = vadd.f32 %v1383_v52, %v1382_v57  ;;  %v1479_v50 = vadd.f32 %v1478_v62, %v1477_v49  ;;  %v1474_v11 = vadd.f32 %v1473_v59, %v1472_v46  ;;  %v1605_v46 = vmul.f32 0.5, %v2130_v45 }
 0x359   : > { %v1353_v3 = vpop.permute.xlu1 %1352  ;;  %v1469_v60 = vadd.f32 %v1468_v19, %v1467_v5 }
 0x35a   : > { %v1485_v6 = vrot.slane %v1484_v0, 4  ;;  %v1385_v10 = vmul.f32 %v2128_v9, %v1353_v3  ;;  %v1480_v12 = vrot.slane %v1479_v50, 2  ;;  %v1475_v20 = vrot.slane %v1474_v11, 1 }
 0x35b   : > { %v1523_v35 = vsel %vm1140_vm3, %v1469_v60, %v1522_v53 }
 0x35c   : > { %v1486_v14 = vadd.f32 %v1485_v6, %v1484_v0  ;;  %v1491_v15 = vadd.f32 %v1385_v10, %v1384_v8  ;;  %v1481_v17 = vadd.f32 %v1480_v12, %v1479_v50  ;;  %v1476_v31 = vadd.f32 %v1475_v20, %v1474_v11 }
 0x35e   : > { %v1487_v21 = vrot.slane %v1486_v14, 2  ;;  %v1492_v22 = vrot.slane %v1491_v15, 4  ;;  %v1482_v24 = vrot.slane %v1481_v17, 1  ;;  %v1524_v36 = vsel %vm1142_vm4, %v1476_v31, %v1523_v35 }
 0x360   : > { %v1488_v25 = vadd.f32 %v1487_v21, %v1486_v14  ;;  %v1493_v26 = vadd.f32 %v1492_v22, %v1491_v15  ;;  %v1483_v61 = vadd.f32 %v1482_v24, %v1481_v17 }
 0x362   : > { %v1489_v29 = vrot.slane %v1488_v25, 1  ;;  %v1494_v30 = vrot.slane %v1493_v26, 2  ;;  %v1525_v38 = vsel %vm1144_vm5, %v1483_v61, %v1524_v36 }
 0x364   : > { %v1495_v55 = vadd.f32 %v1494_v30, %v1493_v26  ;;  %v1490_v33 = vadd.f32 %v1489_v29, %v1488_v25 }
 0x366   : > { %v1496_v34 = vrot.slane %v1495_v55, 1  ;;  %v1526_v39 = vsel %vm1146_vm6, %v1490_v33, %v1525_v38 }
 0x368   : > { %v1497_v37 = vadd.f32 %v1496_v34, %v1495_v55 }
 0x36a   : > { %v1527_v40 = vsel %vm1148_vm7, %v1497_v37, %v1526_v39 }
 0x36b   : > { %1949 = vmatmul.mubr.f32.vlgmr.msra.gmra.mxu1 %v1527_v40 }
 0x42b   : > { %v1950_v43 = vpop.f32.mrf.mxu1 }
 0x42c   : > { %v1608_v44 = vmul.f32 0.5, %v1950_v43 }
 0x42d   : > { %v1596_v47 = vpop.f32.mrf.mxu1 }
 0x42e   : > { %v1610_v48 = vadd.f32 %v1608_v44, %v1606_v42  ;;  %v1607_v49 = vmul.f32 0.5, %v1596_v47 }
 0x430   : > { %1612 = vst [vmem:[%s331_s13 + $0x8] sm:$0xff] %v1610_v48  ;;  %v1609_v51 = vadd.f32 %v1607_v49, %v1605_v46 }
 0x432   : > { %1611 = vst [vmem:[%s331_s13] sm:$0xff] %v1609_v51 }
 0x433   : > { %2224 = shalt.err (!%p2221_p10)
}
 0x434   : > { %s2225_s8 = scalar_lea.hbm %s2742_s15, 256  ;;  %s2229_s11 = scalar_lea.hbm %s2790_s6, 1024 }
 0x435   : > { %p2226_p9 = scmp.ne.s32.totalorder %s2742_s15, %s2225_s8  ;;  %p2230_p6 = scmp.lt.s32.totalorder %s2742_s15, %s2790_s6 }
 0x436   : > { %p2231_p8 = scmp.lt.s32.totalorder %s2229_s11, %s2225_s8 }
 0x437   : > { %p2227_p1 = pnand %p2226_p9, %p2809_p7 }
 0x438   : > { %p2232_p3 = por %p2231_p8, %p2230_p6 }
 0x439   : > { %p2228_p4 = pneg %p2227_p1 }
 0x43b   : > { %p2233_p2 = pnand %p2232_p3, %p2228_p4 }
 0x43d   : > { %2236 = shalt.err (!%p2233_p2)
}
 0x43e   : > { %s2288_s27 = smov 128   ;;  %s2289_s29 = smov 8  }
 0x43f   : > { %1961 = dma.vmem_to_hbm [thread:$0]  (%p2809_p7), %s2737_s9, 256, %s2742_s15, %s1614_s17, %s2288_s27, %s2288_s27, %s2289_s29  }
 0x440 PF: > { %p1983_p11 = scmp.ge.s32.totalorder %s2279_s24, 2  ;;  %s1642_s18 = sand.u32 1, %s2267_s21  }
 0x441   : > { %p2810_p12 = scmp.ne.s32.totalorder %s2798_s28, 0  ;;  %s1643_s25 = scalar_lea.sflag [#allocation4], %s1642_s18 }
 0x443   : > { %p1975_p13 = pnand %p1983_p11, %p2810_p12 }
 0x445   : > { %p1976_p0 = pneg %p1975_p13 }
 0x447   : > { %2262 = dma.done.wait (%p1976_p0), %s1643_s25, 256  }
 0x448   : > { %2264 = vsyncadd (%p1976_p0), %s1643_s25, 4294967040  ;;  %p20_p5 = scmp.ge.s32.totalorder %s2402_s19, 6   ;;  %s2811_s21 = smov %s2271_s22 }
 0x449   : > { %s2812_s22 = smov %s2275_s23  ;;  %s2813_s23 = smov %s2418_s7 }
 0x44a   : > { %s2814_s24 = smov %s2402_s19  ;;  %22 = sbr.rel (!%p20_p5) target bundleno = 6 (0x6), region = 103 }
 0x44f   :  { %1648 = vsyncpa [#allocation3], 1 }
 0x450   :  { %1650 = vsyncpa [#allocation3 + $0x1], 1 }
 0x451   :  { %1651 = vsyncpa [#allocation6], 1 }
 0x452   :  { %1652 = vsyncpa [#allocation4], 1 }
 0x453   :  { %1654 = vsyncpa [#allocation4 + $0x1], 1 }

</bundles_post_ra>
